<compile_context>
chip_gen: v7x
topology: tpu7x:2x2x1
jax: 0.10.0
libtpu: 0.0.40
codegen_flags: <defaults>
</compile_context>

<pallas_src>
import jax
import jax.numpy as jnp
import numpy as np
from jax import lax
from jax.experimental import pallas as pl
from jax.experimental.pallas import tpu as pltpu

C = 24          # filters[0] // 4
NPAR = 4        # output parities (ee, eo, oe, oo) of the stride-2 transposed conv
CF = C * NPAR   # 96: fused channel dim (4 parities x 24 deconv channels)
EPS = 1e-5


def _swint_oam_head_kernel(xp_ref, wd_ref, we_ref, w1_ref, wf_ref, pv_ref, o_ref):
  """Fused deconv / erase / finalconv head for one batch element.

  xp_ref : (1, H+1, W+1, 24) f32  decoder feature, zero-padded bottom/right (halo).
  wd_ref : (4, 24, 96) bf16  per-view fused ConvT taps, BN1 scale folded.
                             view order [x(i,j), x(i,j+1), x(i+1,j), x(i+1,j+1)],
                             col blocks [ee | eo | oe | oo] x 24.
  we_ref : (4, 24, 4)  bf16  erase ConvT taps folded through finalconv (per parity).
  w1_ref : (96, 96)    bf16  block-diagonal 1x1 conv, BN2 scale folded.
  wf_ref : (96, 4)     bf16  finalconv weights, block-structured per parity.
  pv_ref : (1, 384)    f32   packed params: [0:96]=t1 (x4), [128:224]=t2 (x4), [256]=bias.
  o_ref  : (1, H, W, 4) f32  sigmoid output, one channel per parity.
  """
  H = o_ref.shape[1]
  W = o_ref.shape[2]

  # Shifted views needed by the k=3, s=2, p=1, op=1 transposed-conv taps.
  x00 = xp_ref[0, 0:H, 0:W, :].astype(jnp.bfloat16).reshape(H * W, C)          # x[i,   j  ]
  x01 = xp_ref[0, 0:H, 1:W + 1, :].astype(jnp.bfloat16).reshape(H * W, C)      # x[i,   j+1]
  x10 = xp_ref[0, 1:H + 1, 0:W, :].astype(jnp.bfloat16).reshape(H * W, C)      # x[i+1, j  ]
  x11 = xp_ref[0, 1:H + 1, 1:W + 1, :].astype(jnp.bfloat16).reshape(H * W, C)  # x[i+1, j+1]

  def mm(a, w):
    return jnp.dot(a, w, preferred_element_type=jnp.float32)

  # Deconv branch: one fused (Cout = 4 parities x 24) bf16 matmul per shifted view.
  zd = (mm(x00, wd_ref[0]) + mm(x01, wd_ref[1]) +
        mm(x10, wd_ref[2]) + mm(x11, wd_ref[3]))              # (HW, 96) f32
  # Erase branch, pre-folded through the final 1x1: per-parity scalar contribution.
  ze = (mm(x00, we_ref[0]) + mm(x01, we_ref[1]) +
        mm(x10, we_ref[2]) + mm(x11, we_ref[3]))              # (HW, 4) f32

  t1 = pv_ref[0:1, 0:CF]            # (1, 96)  BN1 shift (deconv bias folded), tiled x4
  t2 = pv_ref[0:1, 128:128 + CF]    # (1, 96)  BN2 shift, tiled x4
  bf = pv_ref[0:1, 256:257]         # (1, 1)   finalconv bias (+ folded erase bias)

  y1 = jnp.maximum(zd + t1, 0.0).astype(jnp.bfloat16)         # BN1 + ReLU (scale folded)
  z2 = mm(y1, w1_ref[...])                                    # 1x1 conv, all parities at once
  y2 = jnp.maximum(z2 + t2, 0.0).astype(jnp.bfloat16)         # BN2 + ReLU (scale folded)
  od = mm(y2, wf_ref[...])                                    # finalconv, per parity

  out = jax.nn.sigmoid(od + ze + bf)                          # (HW, 4)
  o_ref[0] = out.reshape(H, W, NPAR)


def swint_oam_head(x_feat, kp):
  """x_feat: [B, H, W, 24] decoder feature (NHWC).  Returns [B, 2H, 2W, 1]."""
  B, H, W, c = x_feat.shape
  assert c == C
  # TODO(synk): the 1-pixel bottom/right halo could be built in-kernel to avoid this
  # extra HBM copy of the feature map.
  xp = jnp.pad(x_feat, ((0, 0), (0, 1), (0, 1), (0, 0)))

  out4 = pl.pallas_call(
      _swint_oam_head_kernel,
      out_shape=jax.ShapeDtypeStruct((B, H, W, NPAR), jnp.float32),
      grid=(B,),
      in_specs=[
          pl.BlockSpec((1, H + 1, W + 1, C), lambda b: (b, 0, 0, 0)),
          pl.BlockSpec((NPAR, C, CF), lambda b: (0, 0, 0)),
          pl.BlockSpec((NPAR, C, NPAR), lambda b: (0, 0, 0)),
          pl.BlockSpec((CF, CF), lambda b: (0, 0)),
          pl.BlockSpec((CF, NPAR), lambda b: (0, 0)),
          pl.BlockSpec((1, 384), lambda b: (0, 0)),
      ],
      out_specs=pl.BlockSpec((1, H, W, NPAR), lambda b: (b, 0, 0, 0)),
      compiler_params=pltpu.CompilerParams(dimension_semantics=("parallel",)),
  )(xp, kp["wd"], kp["we"], kp["w1"], kp["wf"], kp["pv"])

  # Interleave the parity planes (ee, eo, oe, oo) into the full-resolution output.
  o = out4.reshape(B, H, W, 2, 2)            # [..., row parity, col parity]
  o = jnp.transpose(o, (0, 1, 3, 2, 4))      # (B, H, 2, W, 2)
  return o.reshape(B, 2 * H, 2 * W)[..., None]


def init_params(key):
  """Deterministic synthetic parameters with PyTorch-layout shapes."""
  ks = jax.random.split(key, 16)
  Wd = 0.1 * jax.random.normal(ks[0], (C, C, 3, 3), jnp.float32)   # ConvT2d [Cin,Cout,kh,kw]
  bd = 0.1 * jax.random.normal(ks[1], (C,), jnp.float32)
  g1 = 1.0 + 0.1 * jax.random.normal(ks[2], (C,), jnp.float32)
  b1 = 0.1 * jax.random.normal(ks[3], (C,), jnp.float32)
  m1 = 0.1 * jax.random.normal(ks[4], (C,), jnp.float32)
  v1 = 0.5 + 0.5 * jax.random.uniform(ks[5], (C,), jnp.float32)
  W1 = 0.1 * jax.random.normal(ks[6], (C, C, 1, 1), jnp.float32)   # Conv2d [Cout,Cin,1,1]
  g2 = 1.0 + 0.1 * jax.random.normal(ks[7], (C,), jnp.float32)
  b2 = 0.1 * jax.random.normal(ks[8], (C,), jnp.float32)
  m2 = 0.1 * jax.random.normal(ks[9], (C,), jnp.float32)
  v2 = 0.5 + 0.5 * jax.random.uniform(ks[10], (C,), jnp.float32)
  We = 0.1 * jax.random.normal(ks[11], (C, C, 3, 3), jnp.float32)  # erase stand-in ConvT2d
  be = 0.1 * jax.random.normal(ks[12], (C,), jnp.float32)
  Wf = 0.1 * jax.random.normal(ks[13], (1, C, 1, 1), jnp.float32)  # finalconv
  bfin = 0.1 * jax.random.normal(ks[14], (1,), jnp.float32)
  return dict(Wd=Wd, bd=bd, g1=g1, b1=b1, m1=m1, v1=v1, W1=W1,
              g2=g2, b2=b2, m2=m2, v2=v2, We=We, be=be, Wf=Wf, bfin=bfin)


def kernel_params_from_raw(raw):
  """Fold BN scales / biases and fuse the transposed-conv taps at param-prep time."""
  s1 = raw["g1"] / jnp.sqrt(raw["v1"] + EPS)
  t1 = raw["b1"] + (raw["bd"] - raw["m1"]) * s1     # deconv bias folded into BN1 shift
  s2 = raw["g2"] / jnp.sqrt(raw["v2"] + EPS)
  t2 = raw["b2"] - raw["m2"] * s2
  wf = raw["Wf"][0, :, 0, 0]                        # [24] finalconv weight
  bf = raw["bfin"][0] + jnp.dot(raw["be"], wf)      # erase bias folded through finalconv

  # Tap (kh, kw) of ConvTranspose2d(k=3, s=2, p=1, op=1) maps a shifted input view to one
  # output parity.  Fold BN1 scale into the deconv taps, finalconv into the erase taps.
  Wd_f = raw["Wd"] * s1[None, :, None, None]        # [Cin, Cout, 3, 3]
  We_f = jnp.einsum("iokl,o->ikl", raw["We"], wf)   # [Cin, 3, 3]

  def dt(kh, kw):
    return Wd_f[:, :, kh, kw]                       # [Cin, Cout]

  def et(kh, kw):
    return We_f[:, kh, kw][:, None]                 # [Cin, 1]

  z24 = jnp.zeros((C, C), jnp.float32)
  z1 = jnp.zeros((C, 1), jnp.float32)
  # Columns per view: [ee | eo | oe | oo]; rows grouped by shifted view.
  wd = jnp.stack([
      jnp.concatenate([dt(1, 1), dt(1, 2), dt(2, 1), dt(2, 2)], axis=1),  # x[i,   j  ]
      jnp.concatenate([z24,      dt(1, 0), z24,      dt(2, 0)], axis=1),  # x[i,   j+1]
      jnp.concatenate([z24,      z24,      dt(0, 1), dt(0, 2)], axis=1),  # x[i+1, j  ]
      jnp.concatenate([z24,      z24,      z24,      dt(0, 0)], axis=1),  # x[i+1, j+1]
  ])                                                                      # (4, 24, 96)
  we = jnp.stack([
      jnp.concatenate([et(1, 1), et(1, 2), et(2, 1), et(2, 2)], axis=1),
      jnp.concatenate([z1,       et(1, 0), z1,       et(2, 0)], axis=1),
      jnp.concatenate([z1,       z1,       et(0, 1), et(0, 2)], axis=1),
      jnp.concatenate([z1,       z1,       z1,       et(0, 0)], axis=1),
  ])                                                                      # (4, 24, 4)

  # 1x1 conv with BN2 scale folded, replicated block-diagonally over the 4 parities.
  w1s = jnp.transpose(raw["W1"][:, :, 0, 0]) * s2[None, :]                # [Cin, Cout]
  w1 = jax.scipy.linalg.block_diag(w1s, w1s, w1s, w1s)                    # (96, 96)
  wfb = jax.scipy.linalg.block_diag(*([wf[:, None]] * NPAR))              # (96, 4)

  # Packed small params, each slot 128-lane aligned.
  pv = jnp.zeros((1, 384), jnp.float32)
  pv = pv.at[0, 0:CF].set(jnp.tile(t1, NPAR))
  pv = pv.at[0, 128:128 + CF].set(jnp.tile(t2, NPAR))
  pv = pv.at[0, 256].set(bf)

  bf16 = jnp.bfloat16
  return dict(wd=wd.astype(bf16), we=we.astype(bf16),
              w1=w1.astype(bf16), wf=wfb.astype(bf16), pv=pv)


def reference_head(x_feat, raw):
  """Pure-JAX f32 reference matching the PyTorch forward (eval-mode BN), NHWC."""
  def tconv(x, Wt, bias):
    # ConvTranspose2d(k=3, s=2, p=1, output_padding=1) == dilated conv w/ flipped kernel.
    K = jnp.transpose(Wt, (2, 3, 0, 1))[::-1, ::-1, :, :]   # HWIO, spatially flipped
    y = lax.conv_general_dilated(
        x, K, window_strides=(1, 1), padding=[(1, 2), (1, 2)],
        lhs_dilation=(2, 2), dimension_numbers=("NHWC", "HWIO", "NHWC"),
        precision=lax.Precision.HIGHEST)
    return y + bias

  # deconv branch
  y = tconv(x_feat, raw["Wd"], raw["bd"])
  y = (y - raw["m1"]) / jnp.sqrt(raw["v1"] + EPS) * raw["g1"] + raw["b1"]
  y = jnp.maximum(y, 0.0)
  y = jnp.einsum("nhwc,dc->nhwd", y, raw["W1"][:, :, 0, 0],
                 precision=lax.Precision.HIGHEST)
  y = (y - raw["m2"]) / jnp.sqrt(raw["v2"] + EPS) * raw["g2"] + raw["b2"]
  x2 = jnp.maximum(y, 0.0)
  # erase branch (stand-in)
  x1 = tconv(x_feat, raw["We"], raw["be"])
  x = x1 + x2                                               # x1 + x2
  out = jnp.einsum("nhwc,c->nhw", x, raw["Wf"][0, :, 0, 0],
                   precision=lax.Precision.HIGHEST)[..., None] + raw["bfin"][0]
  return jax.nn.sigmoid(out)


if __name__ == "__main__":
  key = jax.random.PRNGKey(0)
  kx, kparam = jax.random.split(key)
  B, H, W = 2, 16, 16
  # Decoder output feature map (stand-in for swin backbone + decoder, see TODO above).
  x_feat = jax.random.normal(kx, (B, H, W, C), jnp.float32)

  raw = init_params(kparam)
  kparams = kernel_params_from_raw(raw)

  out = jax.block_until_ready(swint_oam_head(x_feat, kparams))
  ref = jax.block_until_ready(reference_head(x_feat, raw))

  assert out.shape == (B, 2 * H, 2 * W, 1), out.shape
  # bf16 matmuls with f32 accumulation: tolerance loosened vs. the fp32 version.
  np.testing.assert_allclose(np.asarray(out), np.asarray(ref), atol=2e-2, rtol=2e-2)
  print("KERNEL_OK")
</pallas_src>

<mosaic_0001>
module attributes {stable_mosaic.version = 11 : i64} {
  func.func @_swint_oam_head_kernel(%arg0: i32, %arg1: memref<1x17x17x24xf32, #tpu.memory_space<vmem>>, %arg2: memref<4x24x96xbf16, #tpu.memory_space<vmem>>, %arg3: memref<4x24x4xbf16, #tpu.memory_space<vmem>>, %arg4: memref<96x96xbf16, #tpu.memory_space<vmem>>, %arg5: memref<96x4xbf16, #tpu.memory_space<vmem>>, %arg6: memref<1x384xf32, #tpu.memory_space<vmem>>, %arg7: memref<1x16x16x4xf32, #tpu.memory_space<vmem>>) attributes {dimension_semantics = [#tpu.dimension_semantics<parallel>], iteration_bounds = array<i64: 2>, scalar_prefetch = 0 : i64, scratch_operands = 0 : i64, tpu.core_type = #tpu.core_type<tc>, window_params = [{transform_indices = @transform_0, window_bounds = array<i64: 1, 17, 17, 24>}, {pipeline_mode = #tpu.pipeline_mode<synchronous>, transform_indices = @transform_1, window_bounds = array<i64: 4, 24, 96>}, {pipeline_mode = #tpu.pipeline_mode<synchronous>, transform_indices = @transform_2, window_bounds = array<i64: 4, 24, 4>}, {pipeline_mode = #tpu.pipeline_mode<synchronous>, transform_indices = @transform_3, window_bounds = array<i64: 96, 96>}, {pipeline_mode = #tpu.pipeline_mode<synchronous>, transform_indices = @transform_4, window_bounds = array<i64: 96, 4>}, {pipeline_mode = #tpu.pipeline_mode<synchronous>, transform_indices = @transform_5, window_bounds = array<i64: 1, 384>}, {transform_indices = @transform_6, window_bounds = array<i64: 1, 16, 16, 4>}]} {
    %c0 = arith.constant 0 : index
    %c0_0 = arith.constant 0 : index
    %c0_1 = arith.constant 0 : index
    %c0_2 = arith.constant 0 : index
    %0 = vector.load %arg1[%c0, %c0_0, %c0_1, %c0_2] : memref<1x17x17x24xf32, #tpu.memory_space<vmem>>, vector<1x16x16x24xf32>
    %1 = vector.shape_cast %0 : vector<1x16x16x24xf32> to vector<16x16x24xf32>
    %2 = arith.truncf %1 : vector<16x16x24xf32> to vector<16x16x24xbf16>
    %3 = vector.shape_cast %2 : vector<16x16x24xbf16> to vector<256x24xbf16>
    %c0_3 = arith.constant 0 : index
    %c0_4 = arith.constant 0 : index
    %c1 = arith.constant 1 : index
    %c0_5 = arith.constant 0 : index
    %4 = vector.load %arg1[%c0_3, %c0_4, %c1, %c0_5] : memref<1x17x17x24xf32, #tpu.memory_space<vmem>>, vector<1x16x16x24xf32>
    %5 = vector.shape_cast %4 : vector<1x16x16x24xf32> to vector<16x16x24xf32>
    %6 = arith.truncf %5 : vector<16x16x24xf32> to vector<16x16x24xbf16>
    %7 = vector.shape_cast %6 : vector<16x16x24xbf16> to vector<256x24xbf16>
    %c0_6 = arith.constant 0 : index
    %c1_7 = arith.constant 1 : index
    %c0_8 = arith.constant 0 : index
    %c0_9 = arith.constant 0 : index
    %8 = vector.load %arg1[%c0_6, %c1_7, %c0_8, %c0_9] : memref<1x17x17x24xf32, #tpu.memory_space<vmem>>, vector<1x16x16x24xf32>
    %9 = vector.shape_cast %8 : vector<1x16x16x24xf32> to vector<16x16x24xf32>
    %10 = arith.truncf %9 : vector<16x16x24xf32> to vector<16x16x24xbf16>
    %11 = vector.shape_cast %10 : vector<16x16x24xbf16> to vector<256x24xbf16>
    %c0_10 = arith.constant 0 : index
    %c1_11 = arith.constant 1 : index
    %c1_12 = arith.constant 1 : index
    %c0_13 = arith.constant 0 : index
    %12 = vector.load %arg1[%c0_10, %c1_11, %c1_12, %c0_13] : memref<1x17x17x24xf32, #tpu.memory_space<vmem>>, vector<1x16x16x24xf32>
    %13 = vector.shape_cast %12 : vector<1x16x16x24xf32> to vector<16x16x24xf32>
    %14 = arith.truncf %13 : vector<16x16x24xf32> to vector<16x16x24xbf16>
    %15 = vector.shape_cast %14 : vector<16x16x24xbf16> to vector<256x24xbf16>
    %c0_14 = arith.constant 0 : index
    %c0_15 = arith.constant 0 : index
    %c0_16 = arith.constant 0 : index
    %16 = vector.load %arg2[%c0_14, %c0_15, %c0_16] : memref<4x24x96xbf16, #tpu.memory_space<vmem>>, vector<1x24x96xbf16>
    %17 = vector.shape_cast %16 : vector<1x24x96xbf16> to vector<24x96xbf16>
    %cst = arith.constant dense<0.000000e+00> : vector<256x96xf32>
    %18 = tpu.matmul %3, %17, %cst {dimension_numbers = #tpu.dot_dimension_numbers<[1], [0], [0], [1], [0, 0, 1, 1], [], []>} : vector<256x24xbf16>, vector<24x96xbf16>, vector<256x96xf32> -> vector<256x96xf32>
    %c1_17 = arith.constant 1 : index
    %c0_18 = arith.constant 0 : index
    %c0_19 = arith.constant 0 : index
    %19 = vector.load %arg2[%c1_17, %c0_18, %c0_19] : memref<4x24x96xbf16, #tpu.memory_space<vmem>>, vector<1x24x96xbf16>
    %20 = vector.shape_cast %19 : vector<1x24x96xbf16> to vector<24x96xbf16>
    %cst_20 = arith.constant dense<0.000000e+00> : vector<256x96xf32>
    %21 = tpu.matmul %7, %20, %cst_20 {dimension_numbers = #tpu.dot_dimension_numbers<[1], [0], [0], [1], [0, 0, 1, 1], [], []>} : vector<256x24xbf16>, vector<24x96xbf16>, vector<256x96xf32> -> vector<256x96xf32>
    %22 = arith.addf %18, %21 : vector<256x96xf32>
    %c2 = arith.constant 2 : index
    %c0_21 = arith.constant 0 : index
    %c0_22 = arith.constant 0 : index
    %23 = vector.load %arg2[%c2, %c0_21, %c0_22] : memref<4x24x96xbf16, #tpu.memory_space<vmem>>, vector<1x24x96xbf16>
    %24 = vector.shape_cast %23 : vector<1x24x96xbf16> to vector<24x96xbf16>
    %cst_23 = arith.constant dense<0.000000e+00> : vector<256x96xf32>
    %25 = tpu.matmul %11, %24, %cst_23 {dimension_numbers = #tpu.dot_dimension_numbers<[1], [0], [0], [1], [0, 0, 1, 1], [], []>} : vector<256x24xbf16>, vector<24x96xbf16>, vector<256x96xf32> -> vector<256x96xf32>
    %26 = arith.addf %22, %25 : vector<256x96xf32>
    %c3 = arith.constant 3 : index
    %c0_24 = arith.constant 0 : index
    %c0_25 = arith.constant 0 : index
    %27 = vector.load %arg2[%c3, %c0_24, %c0_25] : memref<4x24x96xbf16, #tpu.memory_space<vmem>>, vector<1x24x96xbf16>
    %28 = vector.shape_cast %27 : vector<1x24x96xbf16> to vector<24x96xbf16>
    %cst_26 = arith.constant dense<0.000000e+00> : vector<256x96xf32>
    %29 = tpu.matmul %15, %28, %cst_26 {dimension_numbers = #tpu.dot_dimension_numbers<[1], [0], [0], [1], [0, 0, 1, 1], [], []>} : vector<256x24xbf16>, vector<24x96xbf16>, vector<256x96xf32> -> vector<256x96xf32>
    %30 = arith.addf %26, %29 : vector<256x96xf32>
    %c0_27 = arith.constant 0 : index
    %c0_28 = arith.constant 0 : index
    %c0_29 = arith.constant 0 : index
    %31 = vector.load %arg3[%c0_27, %c0_28, %c0_29] : memref<4x24x4xbf16, #tpu.memory_space<vmem>>, vector<1x24x4xbf16>
    %32 = vector.shape_cast %31 : vector<1x24x4xbf16> to vector<24x4xbf16>
    %cst_30 = arith.constant dense<0.000000e+00> : vector<256x4xf32>
    %33 = tpu.matmul %3, %32, %cst_30 {dimension_numbers = #tpu.dot_dimension_numbers<[1], [0], [0], [1], [0, 0, 1, 1], [], []>} : vector<256x24xbf16>, vector<24x4xbf16>, vector<256x4xf32> -> vector<256x4xf32>
    %c1_31 = arith.constant 1 : index
    %c0_32 = arith.constant 0 : index
    %c0_33 = arith.constant 0 : index
    %34 = vector.load %arg3[%c1_31, %c0_32, %c0_33] : memref<4x24x4xbf16, #tpu.memory_space<vmem>>, vector<1x24x4xbf16>
    %35 = vector.shape_cast %34 : vector<1x24x4xbf16> to vector<24x4xbf16>
    %cst_34 = arith.constant dense<0.000000e+00> : vector<256x4xf32>
    %36 = tpu.matmul %7, %35, %cst_34 {dimension_numbers = #tpu.dot_dimension_numbers<[1], [0], [0], [1], [0, 0, 1, 1], [], []>} : vector<256x24xbf16>, vector<24x4xbf16>, vector<256x4xf32> -> vector<256x4xf32>
    %37 = arith.addf %33, %36 : vector<256x4xf32>
    %c2_35 = arith.constant 2 : index
    %c0_36 = arith.constant 0 : index
    %c0_37 = arith.constant 0 : index
    %38 = vector.load %arg3[%c2_35, %c0_36, %c0_37] : memref<4x24x4xbf16, #tpu.memory_space<vmem>>, vector<1x24x4xbf16>
    %39 = vector.shape_cast %38 : vector<1x24x4xbf16> to vector<24x4xbf16>
    %cst_38 = arith.constant dense<0.000000e+00> : vector<256x4xf32>
    %40 = tpu.matmul %11, %39, %cst_38 {dimension_numbers = #tpu.dot_dimension_numbers<[1], [0], [0], [1], [0, 0, 1, 1], [], []>} : vector<256x24xbf16>, vector<24x4xbf16>, vector<256x4xf32> -> vector<256x4xf32>
    %41 = arith.addf %37, %40 : vector<256x4xf32>
    %c3_39 = arith.constant 3 : index
    %c0_40 = arith.constant 0 : index
    %c0_41 = arith.constant 0 : index
    %42 = vector.load %arg3[%c3_39, %c0_40, %c0_41] : memref<4x24x4xbf16, #tpu.memory_space<vmem>>, vector<1x24x4xbf16>
    %43 = vector.shape_cast %42 : vector<1x24x4xbf16> to vector<24x4xbf16>
    %cst_42 = arith.constant dense<0.000000e+00> : vector<256x4xf32>
    %44 = tpu.matmul %15, %43, %cst_42 {dimension_numbers = #tpu.dot_dimension_numbers<[1], [0], [0], [1], [0, 0, 1, 1], [], []>} : vector<256x24xbf16>, vector<24x4xbf16>, vector<256x4xf32> -> vector<256x4xf32>
    %45 = arith.addf %41, %44 : vector<256x4xf32>
    %c0_43 = arith.constant 0 : index
    %c0_44 = arith.constant 0 : index
    %46 = vector.load %arg6[%c0_43, %c0_44] : memref<1x384xf32, #tpu.memory_space<vmem>>, vector<1x96xf32>
    %c0_45 = arith.constant 0 : index
    %c128 = arith.constant 128 : index
    %47 = vector.load %arg6[%c0_45, %c128] : memref<1x384xf32, #tpu.memory_space<vmem>>, vector<1x96xf32>
    %c0_46 = arith.constant 0 : index
    %c256 = arith.constant 256 : index
    %48 = vector.load %arg6[%c0_46, %c256] : memref<1x384xf32, #tpu.memory_space<vmem>>, vector<1x1xf32>
    %49 = vector.broadcast %46 : vector<1x96xf32> to vector<256x96xf32>
    %50 = arith.addf %30, %49 : vector<256x96xf32>
    %cst_47 = arith.constant 0.000000e+00 : f32
    %51 = vector.broadcast %cst_47 : f32 to vector<256x96xf32>
    %52 = arith.maximumf %50, %51 : vector<256x96xf32>
    %53 = arith.truncf %52 : vector<256x96xf32> to vector<256x96xbf16>
    %c0_48 = arith.constant 0 : index
    %c0_49 = arith.constant 0 : index
    %54 = vector.load %arg4[%c0_48, %c0_49] : memref<96x96xbf16, #tpu.memory_space<vmem>>, vector<96x96xbf16>
    %cst_50 = arith.constant dense<0.000000e+00> : vector<256x96xf32>
    %55 = tpu.matmul %53, %54, %cst_50 {dimension_numbers = #tpu.dot_dimension_numbers<[1], [0], [0], [1], [0, 0, 1, 1], [], []>} : vector<256x96xbf16>, vector<96x96xbf16>, vector<256x96xf32> -> vector<256x96xf32>
    %56 = vector.broadcast %47 : vector<1x96xf32> to vector<256x96xf32>
    %57 = arith.addf %55, %56 : vector<256x96xf32>
    %cst_51 = arith.constant 0.000000e+00 : f32
    %58 = vector.broadcast %cst_51 : f32 to vector<256x96xf32>
    %59 = arith.maximumf %57, %58 : vector<256x96xf32>
    %60 = arith.truncf %59 : vector<256x96xf32> to vector<256x96xbf16>
    %c0_52 = arith.constant 0 : index
    %c0_53 = arith.constant 0 : index
    %61 = vector.load %arg5[%c0_52, %c0_53] : memref<96x4xbf16, #tpu.memory_space<vmem>>, vector<96x4xbf16>
    %cst_54 = arith.constant dense<0.000000e+00> : vector<256x4xf32>
    %62 = tpu.matmul %60, %61, %cst_54 {dimension_numbers = #tpu.dot_dimension_numbers<[1], [0], [0], [1], [0, 0, 1, 1], [], []>} : vector<256x96xbf16>, vector<96x4xbf16>, vector<256x4xf32> -> vector<256x4xf32>
    %63 = arith.addf %62, %45 : vector<256x4xf32>
    %64 = vector.broadcast %48 : vector<1x1xf32> to vector<256x4xf32>
    %65 = arith.addf %63, %64 : vector<256x4xf32>
    %66 = arith.negf %65 : vector<256x4xf32>
    %67 = math.exp %66 : vector<256x4xf32>
    %cst_55 = arith.constant 1.000000e+00 : f32
    %68 = vector.broadcast %cst_55 : f32 to vector<256x4xf32>
    %69 = arith.addf %68, %67 : vector<256x4xf32>
    %70 = arith.divf %68, %69 : vector<256x4xf32>
    %71 = vector.shape_cast %70 : vector<256x4xf32> to vector<16x16x4xf32>
    %c0_56 = arith.constant 0 : index
    %c0_57 = arith.constant 0 : index
    %c0_58 = arith.constant 0 : index
    %c0_59 = arith.constant 0 : index
    %72 = vector.load %arg7[%c0_56, %c0_57, %c0_58, %c0_59] : memref<1x16x16x4xf32, #tpu.memory_space<vmem>>, vector<1x16x16x4xf32>
    %73 = vector.shape_cast %72 : vector<1x16x16x4xf32> to vector<16x16x4xf32>
    %74 = vector.shape_cast %71 : vector<16x16x4xf32> to vector<1x16x16x4xf32>
    tpu.vector_store %arg7[%c0_56, %c0_57, %c0_58, %c0_59], %74 {strides = array<i32>} : memref<1x16x16x4xf32, #tpu.memory_space<vmem>>, vector<1x16x16x4xf32>,
    return
  }
  func.func @transform_0(%arg0: i32) -> (i32, i32, i32, i32) {
    %c0_i32 = arith.constant 0 : i32
    %c0_i32_0 = arith.constant 0 : i32
    %c0_i32_1 = arith.constant 0 : i32
    %c0_i32_2 = arith.constant 0 : i32
    return %arg0, %c0_i32, %c0_i32_0, %c0_i32_1 : i32, i32, i32, i32
  }
  func.func @transform_1(%arg0: i32) -> (i32, i32, i32) {
    %c0_i32 = arith.constant 0 : i32
    %c0_i32_0 = arith.constant 0 : i32
    %c0_i32_1 = arith.constant 0 : i32
    %c0_i32_2 = arith.constant 0 : i32
    return %c0_i32, %c0_i32_0, %c0_i32_1 : i32, i32, i32
  }
  func.func @transform_2(%arg0: i32) -> (i32, i32, i32) {
    %c0_i32 = arith.constant 0 : i32
    %c0_i32_0 = arith.constant 0 : i32
    %c0_i32_1 = arith.constant 0 : i32
    %c0_i32_2 = arith.constant 0 : i32
    return %c0_i32, %c0_i32_0, %c0_i32_1 : i32, i32, i32
  }
  func.func @transform_3(%arg0: i32) -> (i32, i32) {
    %c0_i32 = arith.constant 0 : i32
    %c0_i32_0 = arith.constant 0 : i32
    %c0_i32_1 = arith.constant 0 : i32
    return %c0_i32, %c0_i32_0 : i32, i32
  }
  func.func @transform_4(%arg0: i32) -> (i32, i32) {
    %c0_i32 = arith.constant 0 : i32
    %c0_i32_0 = arith.constant 0 : i32
    %c0_i32_1 = arith.constant 0 : i32
    return %c0_i32, %c0_i32_0 : i32, i32
  }
  func.func @transform_5(%arg0: i32) -> (i32, i32) {
    %c0_i32 = arith.constant 0 : i32
    %c0_i32_0 = arith.constant 0 : i32
    %c0_i32_1 = arith.constant 0 : i32
    return %c0_i32, %c0_i32_0 : i32, i32
  }
  func.func @transform_6(%arg0: i32) -> (i32, i32, i32, i32) {
    %c0_i32 = arith.constant 0 : i32
    %c0_i32_0 = arith.constant 0 : i32
    %c0_i32_1 = arith.constant 0 : i32
    %c0_i32_2 = arith.constant 0 : i32
    return %arg0, %c0_i32, %c0_i32_0, %c0_i32_1 : i32, i32, i32, i32
  }
}

</mosaic_0001>

<bundles_post_ra>
// kernel: tpu_custom_call.1
= control target key start
LH: loop header
LB: loop body
LE: loop exit
PB: predicated region body
PF: predicated region fallthrough
CT: control target
= control target key end

     0   :  { %s4484_s21 = smov 0   ;;  %s5208_s0 = inlined_call_operand.vmem [shape: f32[2,17,17,24], index: 0, kind: input, shape index: {}]   ;;  %s5209_s1 = inlined_call_operand.vmem [shape: bf16[4,24,96], index: 1, kind: input, shape index: {}]   ;;  %s5210_s2 = inlined_call_operand.vmem [shape: bf16[4,24,4], index: 2, kind: input, shape index: {}]   ;;  %s5211_s3 = inlined_call_operand.vmem [shape: bf16[96,96], index: 3, kind: input, shape index: {}]   ;;  %s5212_s4 = inlined_call_operand.vmem [shape: bf16[96,4], index: 4, kind: input, shape index: {}]   ;;  %s5213_s5 = inlined_call_operand.vmem [shape: f32[1,384], index: 5, kind: input, shape index: {}]   ;;  %s5214_s6 = inlined_call_operand.vmem [shape: f32[2,16,16,4], index: 6, kind: output, shape index: {}]  }
   0x1 LB: > { %s3161_s22 = sadd.s32 4294967295, %s4446_s21   ;;  %p3165_p0 = scmp.ge.s32.totalorder %s4446_s21, 1  ;;  %s4446_s21 = sphi %s4484_s21, %s16_s21  }
   0x2   : > { %p212_p1 = scmp.lt.s32.totalorder %s4446_s21, 3 }
   0x4   : > { %p213_p2 = pnand %p3165_p0, %p212_p1 }
   0x5   : > { %v4284_v0 = vld [vmem:[%s5209_s1 + $0xc] sm:$0xff] (!%p213_p2)   ;;  %v4285_v1 = vld [vmem:[%s5209_s1 + $0x14] ss:$0 sps:$4 sm:$0xff] (!%p213_p2)   ;;  %vm511_vm0 = vcmask (!%p213_p2), 1043456   ;;  %p242_p3 = scmp.lt.s32.totalorder (!%p213_p2), %s3161_s22, 1  ;;  %v4286_v3 = vld [vmem:[%s5209_s1] sm:$0xff] (!%p213_p2)  }
   0x6   : > { %216 = sbr.rel (%p213_p2) target bundleno = 960 (0x3c0), region = 44  ;;  %3665 = vmatprep.subr.bf16.mxu0 (!%p213_p2), %v4284_v0  ;;  %v513_v2 = vsel (!%p213_p2), %vm511_vm0, %v4285_v1, 0  ;;  %vm462_vm1 = vcmask (!%p213_p2), 195584   ;;  %v4287_v13 = vld [vmem:[%s5209_s1 + $0x8] ss:$0 sps:$4 sm:$0xff] (!%p213_p2)   ;;  %v4539_v19 = vld [vmem:[%s5209_s1 + $0x18] sm:$0xff] (!%p213_p2)  }
   0x7   : > { %3666 = vmatpush3.bf16.msra.mxu0 (!%p213_p2), %v4284_v0  ;;  %v734_v18 = vsel (!%p213_p2), %vm511_vm0, %v4287_v13, 0  ;;  %v4289_v0 = vld [vmem:[%s5209_s1 + $0x20] ss:$0 sps:$4 sm:$0xff] (!%p213_p2)   ;;  %vm2325_vm2 = vcmask (!%p213_p2), 785408   ;;  %vm3073_vm3 = vcmask (!%p213_p2), 31744  }
   0x8   : > { %4265 = vmatprep.subr.msk.bf16.mxu0 (!%p213_p2), %vm511_vm0, %v4285_v1 }
   0xb   : > { %3668 = vmatpush3.bf16.msra.mxu0 (!%p213_p2), %v513_v2 }
   0xc   : > { %3701 = vmatprep.subr.bf16.mxu0 (!%p213_p2), %v4286_v3 }
   0xd   : > { %s5216_s22 = smov (!%p242_p3, %s3161_s22), 1 }
   0xe   : > { %s4273_s29 = smul.u32 408, %s5216_s22  ;;  %s3476_s23 = sshll.u32 %s5216_s22, 8 }
   0xf   : > { %s5120_s26 = scalar_lea.vmem %s5214_s6, %s3476_s23 }
  0x10   : > { %s4509_s8 = scalar_lea.vmem %s5208_s0, %s4273_s29 }
  0x11   : > { %v301_v4 = vld [vmem:[%s4509_s8 + $0x1] sm:$0xff]  ;;  %v302_v5 = vld [vmem:[%s4509_s8 + $0x9] sm:$0xff]  ;;  %v303_v6 = vld [vmem:[%s4509_s8 + $0x19] sm:$0xff] }
  0x12   : > { %v333_v7 = vpack.c.bf16 %v302_v5, %v301_v4  ;;  %v304_v8 = vld [vmem:[%s4509_s8 + $0x21] sm:$0xff]  ;;  %v305_v9 = vld [vmem:[%s4509_s8 + $0x31] sm:$0xff]  ;;  %v306_v10 = vld [vmem:[%s4509_s8 + $0x39] sm:$0xff]  ;;  %v959_v5 = vsel %vm511_vm0, %v4289_v0, 0 }
  0x13   : > { %v4517_v11 = vpack.c.bf16 %v304_v8, %v303_v6  ;;  %v4519_v12 = vpack.c.bf16 %v306_v10, %v305_v9  ;;  %v307_v14 = vld [vmem:[%s4509_s8 + $0x49] sm:$0xff]  ;;  %v308_v15 = vld [vmem:[%s4509_s8 + $0x51] sm:$0xff]  ;;  %v309_v16 = vld [vmem:[%s4509_s8 + $0x61] sm:$0xff] }
  0x14   : > { %3669 = vmatprep.mubr.msk.bf16.mxu0 %vm462_vm1, %v333_v7  ;;  %3813 = vmatprep.mubr.msk.bf16.mxu1 %vm462_vm1, %v333_v7  ;;  %v310_v17 = vld [vmem:[%s4509_s8 + $0x69] sm:$0xff]  ;;  %v4541_v20 = vpack.c.bf16 %v308_v15, %v307_v14  ;;  %v311_v22 = vld [vmem:[%s4509_s8 + $0x79] sm:$0xff]  ;;  %v312_v23 = vld [vmem:[%s4509_s8 + $0x81] sm:$0xff] }
  0x15   : > { %3670 = vmatmul.mubr.msk.bf16.vlgmr.msra.gmra.mrb[0].mxu0 %vm462_vm1, %v4517_v11  ;;  %v4543_v21 = vpack.c.bf16 %v310_v17, %v309_v16  ;;  %v313_v24 = vld [vmem:[%s4509_s8 + $0x91] sm:$0xff]  ;;  %v314_v25 = vld [vmem:[%s4509_s8 + $0x99] sm:$0xff]  ;;  %v4554_v26 = vpack.c.bf16 %v312_v23, %v311_v22  ;;  %v315_v28 = vld [vmem:[%s4509_s8 + $0xa9] sm:$0xff] }
  0x16   : > { %3702 = vmatpush3.bf16.msra.mxu0 %v4286_v3  ;;  %3673 = vmatprep.mubr.msk.bf16.mxu0 %vm462_vm1, %v4519_v12  ;;  %v4556_v27 = vpack.c.bf16 %v314_v25, %v313_v24  ;;  %v316_v29 = vld [vmem:[%s4509_s8 + $0xb1] sm:$0xff]  ;;  %v317_v30 = vld [vmem:[%s4509_s8 + $0xc1] sm:$0xff]  ;;  %v318_v31 = vld [vmem:[%s4509_s8 + $0xc9] sm:$0xff] }
  0x17   : > { %4266 = vmatprep.subr.msk.bf16.mxu0 %vm511_vm0, %v4287_v13  ;;  %v4566_v32 = vpack.c.bf16 %v316_v29, %v315_v28  ;;  %v4568_v33 = vpack.c.bf16 %v318_v31, %v317_v30  ;;  %v319_v34 = vld [vmem:[%s4509_s8 + $0xd9] sm:$0xff]  ;;  %v320_v35 = vld [vmem:[%s4509_s8 + $0xe1] sm:$0xff]  ;;  %v321_v36 = vld [vmem:[%s4509_s8 + $0xf1] sm:$0xff] }
  0x18   : > { %v322_v37 = vld [vmem:[%s4509_s8 + $0xf9] sm:$0xff]  ;;  %v4578_v38 = vpack.c.bf16 %v320_v35, %v319_v34  ;;  %v323_v40 = vld [vmem:[%s4509_s8 + $0x109] sm:$0xff]  ;;  %v324_v41 = vld [vmem:[%s4509_s8 + $0x111] sm:$0xff] }
  0x19   : > { %v4580_v39 = vpack.c.bf16 %v322_v37, %v321_v36  ;;  %v325_v42 = vld [vmem:[%s4509_s8 + $0x121] sm:$0xff]  ;;  %v326_v43 = vld [vmem:[%s4509_s8 + $0x129] sm:$0xff]  ;;  %v4590_v44 = vpack.c.bf16 %v324_v41, %v323_v40  ;;  %v327_v46 = vld [vmem:[%s4509_s8 + $0x139] sm:$0xff] }
  0x1a   : > { %3704 = vmatpush3.bf16.msra.mxu0 %v734_v18  ;;  %v4592_v45 = vpack.c.bf16 %v326_v43, %v325_v42  ;;  %v328_v47 = vld [vmem:[%s4509_s8 + $0x141] sm:$0xff]  ;;  %v329_v48 = vld [vmem:[%s4509_s8 + $0x151] sm:$0xff]  ;;  %v330_v49 = vld [vmem:[%s4509_s8 + $0x159] sm:$0xff] }
  0x1b   : > { %3737 = vmatprep.subr.bf16.mxu0 %v4539_v19  ;;  %v4602_v50 = vpack.c.bf16 %v328_v47, %v327_v46  ;;  %v4604_v51 = vpack.c.bf16 %v330_v49, %v329_v48  ;;  %v331_v52 = vld [vmem:[%s4509_s8 + $0x169] sm:$0xff]  ;;  %v332_v53 = vld [vmem:[%s4509_s8 + $0x171] sm:$0xff]  ;;  %v253_v54 = vld [vmem:[%s4509_s8] sm:$0xff] }
  0x1c   : > { %v254_v55 = vld [vmem:[%s4509_s8 + $0x8] sm:$0xff]  ;;  %v4614_v56 = vpack.c.bf16 %v332_v53, %v331_v52  ;;  %v255_v58 = vld [vmem:[%s4509_s8 + $0x18] sm:$0xff]  ;;  %v256_v59 = vld [vmem:[%s4509_s8 + $0x20] sm:$0xff] }
  0x1d   : > { %3674 = vmatmul.mubr.msk.bf16.gmra.mrb[4].mxu0 %vm462_vm1, %v4541_v20  ;;  %v4616_v57 = vpack.c.bf16 %v254_v55, %v253_v54  ;;  %v257_v60 = vld [vmem:[%s4509_s8 + $0x30] sm:$0xff]  ;;  %v258_v61 = vld [vmem:[%s4509_s8 + $0x38] sm:$0xff]  ;;  %v4626_v62 = vpack.c.bf16 %v256_v59, %v255_v58  ;;  %v259_v1 = vld [vmem:[%s4509_s8 + $0x48] sm:$0xff] }
  0x1e   : > { %3677 = vmatprep.mubr.msk.bf16.mxu0 %vm462_vm1, %v4543_v21  ;;  %v4628_v63 = vpack.c.bf16 %v258_v61, %v257_v60  ;;  %v260_v2 = vld [vmem:[%s4509_s8 + $0x50] sm:$0xff]  ;;  %v261_v3 = vld [vmem:[%s4509_s8 + $0x60] sm:$0xff]  ;;  %v262_v4 = vld [vmem:[%s4509_s8 + $0x68] sm:$0xff] }
  0x1f   : > { %v4290_v6 = vld [vmem:[%s5209_s1 + $0x24] sm:$0xff]   ;;  %v4647_v7 = vpack.c.bf16 %v260_v2, %v259_v1  ;;  %v4649_v8 = vpack.c.bf16 %v262_v4, %v261_v3  ;;  %v263_v9 = vld [vmem:[%s4509_s8 + $0x78] sm:$0xff]  ;;  %v265_v13 = vld [vmem:[%s4509_s8 + $0x90] sm:$0xff] }
  0x20   : > { %v264_v10 = vld [vmem:[%s4509_s8 + $0x80] sm:$0xff]  ;;  %v266_v14 = vld [vmem:[%s4509_s8 + $0x98] sm:$0xff]  ;;  %v267_v17 = vld [vmem:[%s4509_s8 + $0xa8] sm:$0xff] }
  0x21   : > { %v4659_v15 = vpack.c.bf16 %v264_v10, %v263_v9  ;;  %v4661_v16 = vpack.c.bf16 %v266_v14, %v265_v13  ;;  %v268_v18 = vld [vmem:[%s4509_s8 + $0xb0] sm:$0xff]  ;;  %v270_v22 = vld [vmem:[%s4509_s8 + $0xc8] sm:$0xff]  ;;  %v271_v25 = vld [vmem:[%s4509_s8 + $0xd8] sm:$0xff] }
  0x22   : > { %v4671_v23 = vpack.c.bf16 %v268_v18, %v267_v17  ;;  %v272_v28 = vld [vmem:[%s4509_s8 + $0xe0] sm:$0xff]  ;;  %v273_v29 = vld [vmem:[%s4509_s8 + $0xf0] sm:$0xff]  ;;  %v274_v30 = vld [vmem:[%s4509_s8 + $0xf8] sm:$0xff] }
  0x23   : > { %v4683_v31 = vpack.c.bf16 %v272_v28, %v271_v25  ;;  %v4685_v34 = vpack.c.bf16 %v274_v30, %v273_v29  ;;  %v275_v35 = vld [vmem:[%s4509_s8 + $0x108] sm:$0xff]  ;;  %v276_v36 = vld [vmem:[%s4509_s8 + $0x110] sm:$0xff]  ;;  %v277_v37 = vld [vmem:[%s4509_s8 + $0x120] sm:$0xff] }
  0x24   : > { %v278_v40 = vld [vmem:[%s4509_s8 + $0x128] sm:$0xff]  ;;  %v4695_v41 = vpack.c.bf16 %v276_v36, %v275_v35  ;;  %v279_v43 = vld [vmem:[%s4509_s8 + $0x138] sm:$0xff]  ;;  %v280_v46 = vld [vmem:[%s4509_s8 + $0x140] sm:$0xff] }
  0x25   : > { %3678 = vmatmul.mubr.msk.bf16.gmra.mrb[8].mxu0 %vm462_vm1, %v4554_v26  ;;  %v4697_v42 = vpack.c.bf16 %v278_v40, %v277_v37  ;;  %v281_v47 = vld [vmem:[%s4509_s8 + $0x150] sm:$0xff]  ;;  %v282_v48 = vld [vmem:[%s4509_s8 + $0x158] sm:$0xff]  ;;  %v4707_v49 = vpack.c.bf16 %v280_v46, %v279_v43  ;;  %v283_v53 = vld [vmem:[%s4509_s8 + $0x168] sm:$0xff] }
  0x26   : > { %3681 = vmatprep.mubr.msk.bf16.mxu0 %vm462_vm1, %v4556_v27  ;;  %v4709_v52 = vpack.c.bf16 %v282_v48, %v281_v47  ;;  %v284_v54 = vld [vmem:[%s4509_s8 + $0x170] sm:$0xff]  ;;  %v4297_v61 = vld [vmem:[%s5210_s2] sm:$0xff]   ;;  %v3200_v4 = vld [vmem:[%s4509_s8 + $0x188] sm:$0xff] }
  0x27   : > { %v4717_v55 = vpack.c.bf16 %v284_v54, %v283_v53  ;;  %v4294_v58 = vld [vmem:[%s5210_s2 + $0xc] sm:$0xff]   ;;  %v4296_v59 = vld [vmem:[%s5210_s2 + $0x14] ss:$0 sps:$4 sm:$0xff]   ;;  %v4292_v2 = vld [vmem:[%s5211_s3] sm:$0xff]  }
  0x28   : > { %3809 = vmatprep.subr.bf16.mxu1 %v4294_v58  ;;  %v1428_v60 = vsel %vm511_vm0, %v4296_v59, 0  ;;  %v3199_v3 = vld [vmem:[%s4509_s8 + $0x180] sm:$0xff]  ;;  %v4295_v9 = vld [vmem:[%s5211_s3 + $0x10] sm:$0xff]   ;;  %v4300_v18 = vld [vmem:[%s5211_s3 + $0x28] sm:$0xff]  }
  0x29   : > { %3810 = vmatpush3.bf16.msra.mxu1 %v4294_v58  ;;  %v4299_v10 = vld [vmem:[%s5211_s3 + $0x20] sm:$0xff]   ;;  %v3232_v14 = vld [vmem:[%s4509_s8 + $0x189] sm:$0xff]  ;;  %v4302_v25 = vld [vmem:[%s5210_s2 + $0x18] sm:$0xff]  }
  0x2a   : > { %4269 = vmatprep.subr.msk.bf16.mxu1 %vm511_vm0, %v4296_v59  ;;  %v3231_v13 = vld [vmem:[%s4509_s8 + $0x181] sm:$0xff]  ;;  %v4303_v28 = vld [vmem:[%s5210_s2 + $0x20] ss:$0 sps:$4 sm:$0xff]   ;;  %v4305_v35 = vld [vmem:[%s5210_s2 + $0x2c] ss:$0 sps:$4 sm:$0xff]  }
  0x2b   : > { %v4852_v17 = vpack.c.bf16 %v3232_v14, %v3231_v13  ;;  %v4304_v29 = vld [vmem:[%s5210_s2 + $0x24] sm:$0xff]   ;;  %v1778_v30 = vsel %vm511_vm0, %v4303_v28, 0  ;;  %v1987_v36 = vsel %vm511_vm0, %v4305_v35, 0 }
  0x2c   : > { %v4306_v37 = vld [vmem:[%s5212_s4] sm:$0xff]  }
  0x2d   : > { %3682 = vmatmul.mubr.msk.bf16.gmra.mrb[12].mxu0 %vm462_vm1, %v4566_v32  ;;  %3812 = vmatpush3.bf16.msra.mxu1 %v1428_v60 }
  0x2e   : > { %3685 = vmatprep.mubr.msk.bf16.mxu0 %vm462_vm1, %v4568_v33  ;;  %3845 = vmatprep.subr.bf16.mxu1 %v4297_v61 }
  0x30   : > { %3814 = vmatmul.mubr.msk.bf16.vlgmr.msra.gmra.mrb[0].mxu1 %vm462_vm1, %v4517_v11 }
  0x31   : > { %3846 = vmatpush3.bf16.msra.mxu1 %v4297_v61  ;;  %3817 = vmatprep.mubr.msk.bf16.mxu1 %vm462_vm1, %v4519_v12 }
  0x35   : > { %3686 = vmatmul.mubr.msk.bf16.gmra.mrb[16].mxu0 %vm462_vm1, %v4578_v38 }
  0x36   : > { %3689 = vmatprep.mubr.msk.bf16.mxu0 %vm462_vm1, %v4580_v39 }
  0x38   : > { %3818 = vmatmul.mubr.msk.bf16.gmra.mrb[4].mxu1 %vm462_vm1, %v4541_v20 }
  0x39   : > { %3821 = vmatprep.mubr.msk.bf16.mxu1 %vm462_vm1, %v4543_v21 }
  0x3d   : > { %3690 = vmatmul.mubr.msk.bf16.gmra.mrb[20].mxu0 %vm462_vm1, %v4590_v44 }
  0x3e   : > { %3693 = vmatprep.mubr.msk.bf16.mxu0 %vm462_vm1, %v4592_v45 }
  0x40   : > { %3822 = vmatmul.mubr.msk.bf16.gmra.mrb[8].mxu1 %vm462_vm1, %v4554_v26 }
  0x41   : > { %3825 = vmatprep.mubr.msk.bf16.mxu1 %vm462_vm1, %v4556_v27 }
  0x45   : > { %3694 = vmatmul.mubr.msk.bf16.gmra.mrb[24].mxu0 %vm462_vm1, %v4602_v50 }
  0x46   : > { %3697 = vmatprep.mubr.msk.bf16.mxu0 %vm462_vm1, %v4604_v51 }
  0x48   : > { %3826 = vmatmul.mubr.msk.bf16.gmra.mrb[12].mxu1 %vm462_vm1, %v4566_v32 }
  0x49   : > { %3829 = vmatprep.mubr.msk.bf16.mxu1 %vm462_vm1, %v4568_v33 }
  0x4d   : > { %3698 = vmatmul.mubr.msk.bf16.gmra.mrb[28].mxu0 %vm462_vm1, %v4614_v56 }
  0x4e   : > { %3705 = vmatprep.mubr.msk.bf16.mxu0 %vm462_vm1, %v4616_v57 }
  0x50   : > { %3830 = vmatmul.mubr.msk.bf16.gmra.mrb[16].mxu1 %vm462_vm1, %v4578_v38 }
  0x51   : > { %3833 = vmatprep.mubr.msk.bf16.mxu1 %vm462_vm1, %v4580_v39 }
  0x55   : > { %3706 = vmatmul.mubr.msk.bf16.vlgmr.msra.gmra.mrb[0].mxu0 %vm462_vm1, %v4626_v62 }
  0x56   : > { %3738 = vmatpush3.bf16.msra.mxu0 %v4539_v19  ;;  %3709 = vmatprep.mubr.msk.bf16.mxu0 %vm462_vm1, %v4628_v63  ;;  %v269_v19 = vld [vmem:[%s4509_s8 + $0xc0] sm:$0xff] }
  0x57   : > { %4267 = vmatprep.subr.msk.bf16.mxu0 %vm511_vm0, %v4289_v0  ;;  %v4673_v24 = vpack.c.bf16 %v270_v22, %v269_v19  ;;  %v4291_v0 = vld [vmem:[%s5209_s1 + $0x2c] ss:$0 sps:$4 sm:$0xff]   ;;  %v4301_v19 = vld [vmem:[%s5210_s2 + $0x8] ss:$0 sps:$4 sm:$0xff]  }
  0x58   : > { %v1216_v1 = vsel %vm511_vm0, %v4291_v0, 0  ;;  %3834 = vmatmul.mubr.msk.bf16.gmra.mrb[20].mxu1 %vm462_vm1, %v4590_v44  ;;  %4270 = vmatprep.subr.msk.bf16.mxu1 %vm511_vm0, %v4301_v19  ;;  %v1601_v22 = vsel %vm511_vm0, %v4301_v19, 0  ;;  %v4308_v19 = vld [vmem:[%s5212_s4 + $0x10] sm:$0xff]  }
  0x59   : > { %3837 = vmatprep.mubr.msk.bf16.mxu1 %vm462_vm1, %v4592_v45  ;;  %3848 = vmatpush3.bf16.msra.mxu1 %v1601_v22 }
  0x5a   : > { %3740 = vmatpush3.bf16.msra.mxu0 %v959_v5  ;;  %v4800_v5 = vpack.c.bf16 %v3200_v4, %v3199_v3  ;;  %3881 = vmatprep.subr.bf16.mxu1 %v4302_v25 }
  0x5b   : > { %3773 = vmatprep.subr.bf16.mxu0 %v4290_v6 }
  0x5d   : > { %3710 = vmatmul.mubr.msk.bf16.gmra.mrb[4].mxu0 %vm462_vm1, %v4647_v7 }
  0x5e   : > { %3713 = vmatprep.mubr.msk.bf16.mxu0 %vm462_vm1, %v4649_v8 }
  0x60   : > { %3838 = vmatmul.mubr.msk.bf16.gmra.mrb[24].mxu1 %vm462_vm1, %v4602_v50 }
  0x61   : > { %3841 = vmatprep.mubr.msk.bf16.mxu1 %vm462_vm1, %v4604_v51 }
  0x65   : > { %3714 = vmatmul.mubr.msk.bf16.gmra.mrb[8].mxu0 %vm462_vm1, %v4659_v15 }
  0x66   : > { %3717 = vmatprep.mubr.msk.bf16.mxu0 %vm462_vm1, %v4661_v16 }
  0x68   : > { %3842 = vmatmul.mubr.msk.bf16.gmra.mrb[28].mxu1 %vm462_vm1, %v4614_v56 }
  0x69   : > { %3849 = vmatprep.mubr.msk.bf16.mxu1 %vm462_vm1, %v4616_v57  ;;  %v4298_v57 = vld [vmem:[%s5211_s3 + $0x18] sm:$0xff]  }
  0x6d   : > { %3718 = vmatmul.mubr.msk.bf16.gmra.mrb[12].mxu0 %vm462_vm1, %v4671_v23 }
  0x6e   : > { %3721 = vmatprep.mubr.msk.bf16.mxu0 %vm462_vm1, %v4673_v24 }
  0x70   : > { %3850 = vmatmul.mubr.msk.bf16.vlgmr.msra.gmra.mrb[0].mxu1 %vm462_vm1, %v4626_v62 }
  0x71   : > { %3853 = vmatprep.mubr.msk.bf16.mxu1 %vm462_vm1, %v4628_v63  ;;  %3882 = vmatpush3.bf16.msra.mxu1 %v4302_v25 }
  0x72   : > { %4271 = vmatprep.subr.msk.bf16.mxu1 %vm511_vm0, %v4303_v28 }
  0x75   : > { %3722 = vmatmul.mubr.msk.bf16.gmra.mrb[16].mxu0 %vm462_vm1, %v4683_v31  ;;  %3884 = vmatpush3.bf16.msra.mxu1 %v1778_v30 }
  0x76   : > { %3725 = vmatprep.mubr.msk.bf16.mxu0 %vm462_vm1, %v4685_v34  ;;  %3917 = vmatprep.subr.bf16.mxu1 %v4304_v29 }
  0x78   : > { %3854 = vmatmul.mubr.msk.bf16.gmra.mrb[4].mxu1 %vm462_vm1, %v4647_v7 }
  0x79   : > { %3857 = vmatprep.mubr.msk.bf16.mxu1 %vm462_vm1, %v4649_v8 }
  0x7d   : > { %3726 = vmatmul.mubr.msk.bf16.gmra.mrb[20].mxu0 %vm462_vm1, %v4695_v41 }
  0x7e   : > { %3729 = vmatprep.mubr.msk.bf16.mxu0 %vm462_vm1, %v4697_v42 }
  0x80   : > { %3858 = vmatmul.mubr.msk.bf16.gmra.mrb[8].mxu1 %vm462_vm1, %v4659_v15 }
  0x81   : > { %3861 = vmatprep.mubr.msk.bf16.mxu1 %vm462_vm1, %v4661_v16 }
  0x85   : > { %3730 = vmatmul.mubr.msk.bf16.gmra.mrb[24].mxu0 %vm462_vm1, %v4707_v49 }
  0x86   : > { %3733 = vmatprep.mubr.msk.bf16.mxu0 %vm462_vm1, %v4709_v52 }
  0x88   : > { %3862 = vmatmul.mubr.msk.bf16.gmra.mrb[12].mxu1 %vm462_vm1, %v4671_v23 }
  0x89   : > { %3865 = vmatprep.mubr.msk.bf16.mxu1 %vm462_vm1, %v4673_v24 }
  0x8d   : > { %3734 = vmatmul.mubr.msk.bf16.gmra.mrb[28].mxu0 %vm462_vm1, %v4717_v55 }
  0x8e   : > { %3741 = vmatprep.mubr.msk.bf16.mxu0 %vm462_vm1, %v4626_v62 }
  0x90   : > { %3866 = vmatmul.mubr.msk.bf16.gmra.mrb[16].mxu1 %vm462_vm1, %v4683_v31 }
  0x91   : > { %3869 = vmatprep.mubr.msk.bf16.mxu1 %vm462_vm1, %v4685_v34 }
  0x95   : > { %3742 = vmatmul.mubr.msk.bf16.vlgmr.msra.gmra.mrb[0].mxu0 %vm462_vm1, %v4628_v63 }
  0x96   : > { %3774 = vmatpush3.bf16.msra.mxu0 %v4290_v6  ;;  %3745 = vmatprep.mubr.msk.bf16.mxu0 %vm462_vm1, %v4647_v7  ;;  %v4293_v6 = vld [vmem:[%s5211_s3 + $0x8] sm:$0xff]  }
  0x97   : > { %4268 = vmatprep.subr.msk.bf16.mxu0 %vm511_vm0, %v4291_v0 }
  0x98   : > { %3870 = vmatmul.mubr.msk.bf16.gmra.mrb[20].mxu1 %vm462_vm1, %v4695_v41 }
  0x99   : > { %3873 = vmatprep.mubr.msk.bf16.mxu1 %vm462_vm1, %v4697_v42 }
  0x9a   : > { %3776 = vmatpush3.bf16.msra.mxu0 %v1216_v1 }
  0x9b   : > { %3953 = vmatprep.subr.bf16.mxu0 %v4292_v2 }
  0x9d   : > { %3746 = vmatmul.mubr.msk.bf16.gmra.mrb[4].mxu0 %vm462_vm1, %v4649_v8 }
  0x9e   : > { %3749 = vmatprep.mubr.msk.bf16.mxu0 %vm462_vm1, %v4659_v15 }
  0xa0   : > { %3874 = vmatmul.mubr.msk.bf16.gmra.mrb[24].mxu1 %vm462_vm1, %v4707_v49 }
  0xa1   : > { %3877 = vmatprep.mubr.msk.bf16.mxu1 %vm462_vm1, %v4709_v52 }
  0xa5   : > { %3750 = vmatmul.mubr.msk.bf16.gmra.mrb[8].mxu0 %vm462_vm1, %v4661_v16 }
  0xa6   : > { %3753 = vmatprep.mubr.msk.bf16.mxu0 %vm462_vm1, %v4671_v23 }
  0xa8   : > { %3878 = vmatmul.mubr.msk.bf16.gmra.mrb[28].mxu1 %vm462_vm1, %v4717_v55 }
  0xa9   : > { %3885 = vmatprep.mubr.msk.bf16.mxu1 %vm462_vm1, %v4626_v62  ;;  %v4942_v62 = vld [vmem:[%s5213_s5] ss:$0 sm:$0xff] }
  0xad   : > { %3754 = vmatmul.mubr.msk.bf16.gmra.mrb[12].mxu0 %vm462_vm1, %v4673_v24 }
  0xae   : > { %3757 = vmatprep.mubr.msk.bf16.mxu0 %vm462_vm1, %v4683_v31 }
  0xb0   : > { %3886 = vmatmul.mubr.msk.bf16.vlgmr.msra.gmra.mrb[0].mxu1 %vm462_vm1, %v4628_v63 }
  0xb1   : > { %3918 = vmatpush3.bf16.msra.mxu1 %v4304_v29  ;;  %3889 = vmatprep.mubr.msk.bf16.mxu1 %vm462_vm1, %v4647_v7 }
  0xb2   : > { %4272 = vmatprep.subr.msk.bf16.mxu1 %vm511_vm0, %v4305_v35 }
  0xb5   : > { %3758 = vmatmul.mubr.msk.bf16.gmra.mrb[16].mxu0 %vm462_vm1, %v4685_v34  ;;  %3920 = vmatpush3.bf16.msra.mxu1 %v1987_v36 }
  0xb6   : > { %3761 = vmatprep.mubr.msk.bf16.mxu0 %vm462_vm1, %v4695_v41  ;;  %3997 = vmatprep.subr.bf16.mxu1 %v4306_v37 }
  0xb8   : > { %3890 = vmatmul.mubr.msk.bf16.gmra.mrb[4].mxu1 %vm462_vm1, %v4649_v8 }
  0xb9   : > { %3893 = vmatprep.mubr.msk.bf16.mxu1 %vm462_vm1, %v4659_v15 }
  0xbd   : > { %3762 = vmatmul.mubr.msk.bf16.gmra.mrb[20].mxu0 %vm462_vm1, %v4697_v42 }
  0xbe   : > { %3765 = vmatprep.mubr.msk.bf16.mxu0 %vm462_vm1, %v4707_v49 }
  0xc0   : > { %3894 = vmatmul.mubr.msk.bf16.gmra.mrb[8].mxu1 %vm462_vm1, %v4661_v16 }
  0xc1   : > { %3897 = vmatprep.mubr.msk.bf16.mxu1 %vm462_vm1, %v4671_v23 }
  0xc5   : > { %3766 = vmatmul.mubr.msk.bf16.gmra.mrb[24].mxu0 %vm462_vm1, %v4709_v52 }
  0xc6   : > { %3769 = vmatprep.mubr.msk.bf16.mxu0 %vm462_vm1, %v4717_v55 }
  0xc8   : > { %3898 = vmatmul.mubr.msk.bf16.gmra.mrb[12].mxu1 %vm462_vm1, %v4673_v24 }
  0xc9   : > { %3901 = vmatprep.mubr.msk.bf16.mxu1 %vm462_vm1, %v4683_v31 }
  0xcd   : > { %3770 = vmatmul.mubr.msk.bf16.gmra.mrb[28].mxu0 %vm462_vm1, %v4800_v5 }
  0xce   : > { %3777 = vmatprep.mubr.msk.bf16.mxu0 %vm462_vm1, %v4517_v11 }
  0xd0   : > { %3902 = vmatmul.mubr.msk.bf16.gmra.mrb[16].mxu1 %vm462_vm1, %v4685_v34 }
  0xd1   : > { %3905 = vmatprep.mubr.msk.bf16.mxu1 %vm462_vm1, %v4695_v41 }
  0xd5   : > { %3778 = vmatmul.mubr.msk.bf16.vlgmr.msra.gmra.mrb[0].mxu0 %vm462_vm1, %v4519_v12 }
  0xd6   : > { %3781 = vmatprep.mubr.msk.bf16.mxu0 %vm462_vm1, %v4541_v20  ;;  %3954 = vmatpush3.bf16.msra.mxu0 %v4292_v2 }
  0xd7   : > { %3955 = vmatprep.subr.bf16.mxu0 %v4293_v6 }
  0xd8   : > { %3906 = vmatmul.mubr.msk.bf16.gmra.mrb[20].mxu1 %vm462_vm1, %v4697_v42 }
  0xd9   : > { %3909 = vmatprep.mubr.msk.bf16.mxu1 %vm462_vm1, %v4707_v49 }
  0xda   : > { %3956 = vmatpush3.bf16.msra.mxu0 %v4293_v6 }
  0xdb   : > { %3957 = vmatprep.subr.bf16.mxu0 %v4295_v9 }
  0xdd   : > { %3782 = vmatmul.mubr.msk.bf16.gmra.mrb[4].mxu0 %vm462_vm1, %v4543_v21 }
  0xde   : > { %3785 = vmatprep.mubr.msk.bf16.mxu0 %vm462_vm1, %v4554_v26  ;;  %3958 = vmatpush3.bf16.msra.mxu0 %v4295_v9  ;;  %v4307_v9 = vld [vmem:[%s5212_s4 + $0x8] sm:$0xff]  }
  0xdf   : > { %3959 = vmatprep.subr.bf16.mxu0 %v4298_v57 }
  0xe0   : > { %3910 = vmatmul.mubr.msk.bf16.gmra.mrb[24].mxu1 %vm462_vm1, %v4709_v52 }
  0xe1   : > { %3913 = vmatprep.mubr.msk.bf16.mxu1 %vm462_vm1, %v4717_v55 }
  0xe2   : > { %3960 = vmatpush3.bf16.msra.mxu0 %v4298_v57 }
  0xe3   : > { %3961 = vmatprep.subr.bf16.mxu0 %v4299_v10 }
  0xe5   : > { %3786 = vmatmul.mubr.msk.bf16.gmra.mrb[8].mxu0 %vm462_vm1, %v4556_v27 }
  0xe6   : > { %3789 = vmatprep.mubr.msk.bf16.mxu0 %vm462_vm1, %v4566_v32  ;;  %3962 = vmatpush3.bf16.msra.mxu0 %v4299_v10 }
  0xe7   : > { %3963 = vmatprep.subr.bf16.mxu0 %v4300_v18 }
  0xe8   : > { %3914 = vmatmul.mubr.msk.bf16.gmra.mrb[28].mxu1 %vm462_vm1, %v4800_v5 }
  0xe9   : > { %3921 = vmatprep.mubr.msk.bf16.mxu1 %vm462_vm1, %v4517_v11 }
  0xea   : > { %3964 = vmatpush3.bf16.msra.mxu0 %v4300_v18 }
  0xed   : > { %3790 = vmatmul.mubr.msk.bf16.gmra.mrb[12].mxu0 %vm462_vm1, %v4568_v33 }
  0xee   : > { %3793 = vmatprep.mubr.msk.bf16.mxu0 %vm462_vm1, %v4578_v38 }
  0xf0   : > { %3922 = vmatmul.mubr.msk.bf16.vlgmr.msra.gmra.mrb[0].mxu1 %vm462_vm1, %v4519_v12 }
  0xf1   : > { %3998 = vmatpush3.bf16.msra.mxu1 %v4306_v37  ;;  %3925 = vmatprep.mubr.msk.bf16.mxu1 %vm462_vm1, %v4541_v20  ;;  %v4309_v20 = vld [vmem:[%s5212_s4 + $0x18] sm:$0xff]  }
  0xf2   : > { %3999 = vmatprep.subr.bf16.mxu1 %v4307_v9 }
  0xf5   : > { %3794 = vmatmul.mubr.msk.bf16.gmra.mrb[16].mxu0 %vm462_vm1, %v4580_v39  ;;  %4000 = vmatpush3.bf16.msra.mxu1 %v4307_v9 }
  0xf6   : > { %3797 = vmatprep.mubr.msk.bf16.mxu0 %vm462_vm1, %v4590_v44  ;;  %4001 = vmatprep.subr.bf16.mxu1 %v4308_v19 }
  0xf8   : > { %3926 = vmatmul.mubr.msk.bf16.gmra.mrb[4].mxu1 %vm462_vm1, %v4543_v21 }
  0xf9   : > { %3929 = vmatprep.mubr.msk.bf16.mxu1 %vm462_vm1, %v4554_v26  ;;  %4002 = vmatpush3.bf16.msra.mxu1 %v4308_v19 }
  0xfa   : > { %4003 = vmatprep.subr.bf16.mxu1 %v4309_v20 }
  0xfd   : > { %3798 = vmatmul.mubr.msk.bf16.gmra.mrb[20].mxu0 %vm462_vm1, %v4592_v45  ;;  %4004 = vmatpush3.bf16.msra.mxu1 %v4309_v20 }
  0xfe   : > { %3801 = vmatprep.mubr.msk.bf16.mxu0 %vm462_vm1, %v4602_v50 }
 0x100   : > { %3930 = vmatmul.mubr.msk.bf16.gmra.mrb[8].mxu1 %vm462_vm1, %v4556_v27 }
 0x101   : > { %3933 = vmatprep.mubr.msk.bf16.mxu1 %vm462_vm1, %v4566_v32 }
 0x105   : > { %3802 = vmatmul.mubr.msk.bf16.gmra.mrb[24].mxu0 %vm462_vm1, %v4604_v51 }
 0x106   : > { %3805 = vmatprep.mubr.msk.bf16.mxu0 %vm462_vm1, %v4614_v56 }
 0x108   : > { %3934 = vmatmul.mubr.msk.bf16.gmra.mrb[12].mxu1 %vm462_vm1, %v4568_v33 }
 0x109   : > { %3937 = vmatprep.mubr.msk.bf16.mxu1 %vm462_vm1, %v4578_v38 }
 0x10d   : > { %3806 = vmatmul.mubr.msk.bf16.gmra.mrb[28].mxu0 %vm462_vm1, %v4852_v17 }
 0x110   : > { %3938 = vmatmul.mubr.msk.bf16.gmra.mrb[16].mxu1 %vm462_vm1, %v4580_v39 }
 0x111   : > { %3941 = vmatprep.mubr.msk.bf16.mxu1 %vm462_vm1, %v4590_v44 }
 0x118   : > { %3942 = vmatmul.mubr.msk.bf16.gmra.mrb[20].mxu1 %vm462_vm1, %v4592_v45  ;;  %v4311_v45 = vld [vmem:[%s5212_s4 + $0x28] sm:$0xff]  }
 0x119   : > { %3945 = vmatprep.mubr.msk.bf16.mxu1 %vm462_vm1, %v4602_v50  ;;  %v3441_v50 = vld [vmem:[%s5213_s5 + $0x2] ss:$0 sm:$0xff] }
 0x120   : > { %3946 = vmatmul.mubr.msk.bf16.gmra.mrb[24].mxu1 %vm462_vm1, %v4604_v51  ;;  %v5051_v51 = vld [vmem:[%s5213_s5 + $0x1] ss:$0 sm:$0xff] }
 0x121   : > { %3949 = vmatprep.mubr.msk.bf16.mxu1 %vm462_vm1, %v4614_v56 }
 0x128   : > { %3950 = vmatmul.mubr.msk.bf16.gmra.mrb[28].mxu1 %vm462_vm1, %v4852_v17 }
 0x1a8   : > { %v3779_v63 = vpop.f32.mrb[0].mxu0 }
 0x1a9   : > { %v2193_v7 = vadd.f32 %v3779_v63, %v4942_v62  ;;  %v1252_v8 = vpop.f32.mrb[1].mxu0 }
 0x1aa   : > { %v2191_v15 = vadd.f32 %v4942_v62, %v1252_v8  ;;  %v3780_v16 = vpop.f32.mrb[2].mxu0 }
 0x1ab   : > { %v2194_v23 = vadd.f32 %v3780_v16, %v4942_v62  ;;  %v1255_v24 = vpop.f32.mrb[3].mxu0  ;;  %v2225_v34 = vmax.f32 %v2193_v7, 0.0 }
 0x1ac   : > { %v2192_v31 = vadd.f32 %v4942_v62, %v1255_v24  ;;  %v2223_v41 = vmax.f32 %v2191_v15, 0.0 }
 0x1ad   : > { %v2226_v40 = vmax.f32 %v2194_v23, 0.0  ;;  %v4310_v23 = vld [vmem:[%s5212_s4 + $0x20] sm:$0xff]  }
 0x1ae   : > { %v2224_v42 = vmax.f32 %v2192_v31, 0.0  ;;  %4005 = vmatprep.subr.bf16.mxu1 %v4310_v23 }
 0x1af   : > { %v2256_v43 = vpack.c.bf16 %v2226_v40, %v2225_v34  ;;  %4006 = vmatpush3.bf16.msra.mxu1 %v4310_v23 }
 0x1b0   : > { %v2255_v46 = vpack.c.bf16 %v2224_v42, %v2223_v41  ;;  %v3783_v47 = vpop.f32.mrb[4].mxu0  ;;  %4007 = vmatprep.subr.bf16.mxu1 %v4311_v45 }
 0x1b1   : > { %v2197_v48 = vadd.f32 %v3783_v47, %v4942_v62  ;;  %v1268_v49 = vpop.f32.mrb[5].mxu0 }
 0x1b2   : > { %v2195_v53 = vadd.f32 %v4942_v62, %v1268_v49  ;;  %v3784_v54 = vpop.f32.mrb[6].mxu0  ;;  %3965 = vmatprep.mubr.msk.bf16.mxu0 %vm2325_vm2, %v2255_v46 }
 0x1b3   : > { %v2198_v52 = vadd.f32 %v3784_v54, %v4942_v62  ;;  %v1271_v58 = vpop.f32.mrb[7].mxu0  ;;  %3966 = vmatmul.mubr.msk.bf16.vlgmr.msra.gmra.mrb[32].mxu0 %vm2325_vm2, %v2256_v43  ;;  %v2229_v59 = vmax.f32 %v2197_v48, 0.0  ;;  %4008 = vmatpush3.bf16.msra.mxu1 %v4311_v45 }
 0x1b4   : > { %v2196_v55 = vadd.f32 %v4942_v62, %v1271_v58  ;;  %v2227_v61 = vmax.f32 %v2195_v53, 0.0 }
 0x1b5   : > { %v2230_v60 = vmax.f32 %v2198_v52, 0.0 }
 0x1b6   : > { %v2228_v0 = vmax.f32 %v2196_v55, 0.0 }
 0x1b7   : > { %v2258_v1 = vpack.c.bf16 %v2230_v60, %v2229_v59 }
 0x1b8   : > { %v2257_v2 = vpack.c.bf16 %v2228_v0, %v2227_v61  ;;  %v3787_v3 = vpop.f32.mrb[8].mxu0 }
 0x1b9   : > { %v2201_v4 = vadd.f32 %v3787_v3, %v4942_v62  ;;  %v1284_v6 = vpop.f32.mrb[9].mxu0 }
 0x1ba   : > { %v2199_v5 = vadd.f32 %v4942_v62, %v1284_v6  ;;  %v3788_v57 = vpop.f32.mrb[10].mxu0  ;;  %3969 = vmatprep.mubr.msk.bf16.mxu0 %vm2325_vm2, %v2257_v2 }
 0x1bb   : > { %v2202_v11 = vadd.f32 %v3788_v57, %v4942_v62  ;;  %v1287_v10 = vpop.f32.mrb[11].mxu0  ;;  %3970 = vmatmul.mubr.msk.bf16.gmra.mrb[36].mxu0 %vm2325_vm2, %v2258_v1  ;;  %v2233_v14 = vmax.f32 %v2201_v4, 0.0 }
 0x1bc   : > { %v2200_v13 = vadd.f32 %v4942_v62, %v1287_v10  ;;  %v2231_v22 = vmax.f32 %v2199_v5, 0.0 }
 0x1bd   : > { %v2234_v18 = vmax.f32 %v2202_v11, 0.0 }
 0x1be   : > { %v2232_v25 = vmax.f32 %v2200_v13, 0.0 }
 0x1bf   : > { %v2260_v28 = vpack.c.bf16 %v2234_v18, %v2233_v14 }
 0x1c0   : > { %v2259_v29 = vpack.c.bf16 %v2232_v25, %v2231_v22  ;;  %v3791_v30 = vpop.f32.mrb[12].mxu0 }
 0x1c1   : > { %v2205_v12 = vadd.f32 %v3791_v30, %v4942_v62  ;;  %v1300_v35 = vpop.f32.mrb[13].mxu0 }
 0x1c2   : > { %v2203_v36 = vadd.f32 %v4942_v62, %v1300_v35  ;;  %v3792_v37 = vpop.f32.mrb[14].mxu0  ;;  %3973 = vmatprep.mubr.msk.bf16.mxu0 %vm2325_vm2, %v2259_v29 }
 0x1c3   : > { %v2206_v63 = vadd.f32 %v3792_v37, %v4942_v62  ;;  %v1303_v7 = vpop.f32.mrb[15].mxu0  ;;  %3974 = vmatmul.mubr.msk.bf16.gmra.mrb[40].mxu0 %vm2325_vm2, %v2260_v28  ;;  %v2237_v15 = vmax.f32 %v2205_v12, 0.0 }
 0x1c4   : > { %v2204_v8 = vadd.f32 %v4942_v62, %v1303_v7  ;;  %v2235_v24 = vmax.f32 %v2203_v36, 0.0 }
 0x1c5   : > { %v2238_v16 = vmax.f32 %v2206_v63, 0.0 }
 0x1c6   : > { %v2236_v31 = vmax.f32 %v2204_v8, 0.0 }
 0x1c7   : > { %v2262_v34 = vpack.c.bf16 %v2238_v16, %v2237_v15 }
 0x1c8   : > { %v2261_v40 = vpack.c.bf16 %v2236_v31, %v2235_v24  ;;  %v3795_v41 = vpop.f32.mrb[16].mxu0 }
 0x1c9   : > { %v2209_v21 = vadd.f32 %v3795_v41, %v4942_v62  ;;  %v1316_v42 = vpop.f32.mrb[17].mxu0 }
 0x1ca   : > { %v2207_v26 = vadd.f32 %v4942_v62, %v1316_v42  ;;  %v3796_v43 = vpop.f32.mrb[18].mxu0  ;;  %3977 = vmatprep.mubr.msk.bf16.mxu0 %vm2325_vm2, %v2261_v40 }
 0x1cb   : > { %v2210_v46 = vadd.f32 %v3796_v43, %v4942_v62  ;;  %v1319_v47 = vpop.f32.mrb[19].mxu0  ;;  %3978 = vmatmul.mubr.msk.bf16.gmra.mrb[44].mxu0 %vm2325_vm2, %v2262_v34  ;;  %v2241_v49 = vmax.f32 %v2209_v21, 0.0 }
 0x1cc   : > { %v2208_v48 = vadd.f32 %v4942_v62, %v1319_v47  ;;  %v2239_v54 = vmax.f32 %v2207_v26, 0.0 }
 0x1cd   : > { %v2242_v53 = vmax.f32 %v2210_v46, 0.0 }
 0x1ce   : > { %v2240_v52 = vmax.f32 %v2208_v48, 0.0 }
 0x1cf   : > { %v2264_v58 = vpack.c.bf16 %v2242_v53, %v2241_v49 }
 0x1d0   : > { %v2263_v55 = vpack.c.bf16 %v2240_v52, %v2239_v54  ;;  %v3799_v59 = vpop.f32.mrb[20].mxu0 }
 0x1d1   : > { %v2213_v60 = vadd.f32 %v3799_v59, %v4942_v62  ;;  %v1332_v61 = vpop.f32.mrb[21].mxu0 }
 0x1d2   : > { %v2211_v0 = vadd.f32 %v4942_v62, %v1332_v61  ;;  %v3800_v1 = vpop.f32.mrb[22].mxu0  ;;  %3981 = vmatprep.mubr.msk.bf16.mxu0 %vm2325_vm2, %v2263_v55 }
 0x1d3   : > { %v2214_v27 = vadd.f32 %v3800_v1, %v4942_v62  ;;  %v1335_v2 = vpop.f32.mrb[23].mxu0  ;;  %3982 = vmatmul.mubr.msk.bf16.gmra.mrb[48].mxu0 %vm2325_vm2, %v2264_v58  ;;  %v2245_v3 = vmax.f32 %v2213_v60, 0.0 }
 0x1d4   : > { %v2212_v32 = vadd.f32 %v4942_v62, %v1335_v2  ;;  %v2243_v6 = vmax.f32 %v2211_v0, 0.0 }
 0x1d5   : > { %v2246_v4 = vmax.f32 %v2214_v27, 0.0 }
 0x1d6   : > { %v2244_v9 = vmax.f32 %v2212_v32, 0.0 }
 0x1d7   : > { %v2266_v5 = vpack.c.bf16 %v2246_v4, %v2245_v3 }
 0x1d8   : > { %v2265_v57 = vpack.c.bf16 %v2244_v9, %v2243_v6  ;;  %v3803_v11 = vpop.f32.mrb[24].mxu0 }
 0x1d9   : > { %v2217_v10 = vadd.f32 %v3803_v11, %v4942_v62  ;;  %v1348_v13 = vpop.f32.mrb[25].mxu0 }
 0x1da   : > { %v2215_v14 = vadd.f32 %v4942_v62, %v1348_v13  ;;  %v3804_v18 = vpop.f32.mrb[26].mxu0  ;;  %3985 = vmatprep.mubr.msk.bf16.mxu0 %vm2325_vm2, %v2265_v57 }
 0x1db   : > { %v2218_v33 = vadd.f32 %v3804_v18, %v4942_v62  ;;  %v1351_v19 = vpop.f32.mrb[27].mxu0  ;;  %3986 = vmatmul.mubr.msk.bf16.gmra.mrb[52].mxu0 %vm2325_vm2, %v2266_v5  ;;  %v2249_v22 = vmax.f32 %v2217_v10, 0.0 }
 0x1dc   : > { %v2216_v38 = vadd.f32 %v4942_v62, %v1351_v19  ;;  %v2247_v28 = vmax.f32 %v2215_v14, 0.0 }
 0x1dd   : > { %v2250_v25 = vmax.f32 %v2218_v33, 0.0 }
 0x1de   : > { %v2248_v29 = vmax.f32 %v2216_v38, 0.0 }
 0x1df   : > { %v2268_v30 = vpack.c.bf16 %v2250_v25, %v2249_v22 }
 0x1e0   : > { %v2267_v12 = vpack.c.bf16 %v2248_v29, %v2247_v28  ;;  %v3807_v35 = vpop.f32.mrb[28].mxu0 }
 0x1e1   : > { %v2221_v20 = vadd.f32 %v3807_v35, %v4942_v62  ;;  %v1364_v36 = vpop.f32.mrb[29].mxu0 }
 0x1e2   : > { %v2219_v37 = vadd.f32 %v4942_v62, %v1364_v36  ;;  %v3808_v63 = vpop.f32.mrb[30].mxu0  ;;  %3989 = vmatprep.mubr.msk.bf16.mxu0 %vm2325_vm2, %v2267_v12 }
 0x1e3   : > { %v2222_v39 = vadd.f32 %v3808_v63, %v4942_v62  ;;  %v1367_v7 = vpop.f32.mrb[31].mxu0  ;;  %3990 = vmatmul.mubr.msk.bf16.gmra.mrb[56].mxu0 %vm2325_vm2, %v2268_v30  ;;  %v2253_v8 = vmax.f32 %v2221_v20, 0.0 }
 0x1e4   : > { %v2220_v44 = vadd.f32 %v4942_v62, %v1367_v7  ;;  %v2251_v16 = vmax.f32 %v2219_v37, 0.0  ;;  %v4448_v62 = vmov 0  }
 0x1e5   : > { %v2254_v15 = vmax.f32 %v2222_v39, 0.0  ;;  %4283 = vset.pattern.permute.xlu0 %v4448_v62 }
 0x1e6   : > { %v2252_v23 = vmax.f32 %v2220_v44, 0.0  ;;  %2846 = vperm.xlu0 %4283, %v3441_v50  }
 0x1e7   : > { %v2270_v24 = vpack.c.bf16 %v2254_v15, %v2253_v8 }
 0x1e8   : > { %v2269_v31 = vpack.c.bf16 %v2252_v23, %v2251_v16 }
 0x1ea   : > { %3993 = vmatprep.mubr.msk.bf16.mxu0 %vm2325_vm2, %v2269_v31 }
 0x1eb   : > { %3994 = vmatmul.mubr.msk.bf16.gmra.mrb[60].mxu0 %vm2325_vm2, %v2270_v24 }
 0x286   : > { %v3967_v56 = vpop.f32.mrb[32].mxu0 }
 0x287   : > { %v2417_v17 = vadd.f32 %v3967_v56, %v5051_v51  ;;  %v2408_v34 = vpop.f32.mrb[33].mxu0 }
 0x288   : > { %v2409_v40 = vadd.f32 %v5051_v51, %v2408_v34  ;;  %v3968_v41 = vpop.f32.mrb[34].mxu0 }
 0x289   : > { %v2420_v21 = vadd.f32 %v3968_v41, %v5051_v51  ;;  %v2411_v42 = vpop.f32.mrb[35].mxu0  ;;  %v2537_v43 = vmax.f32 %v2417_v17, 0.0 }
 0x28a   : > { %v2412_v26 = vadd.f32 %v5051_v51, %v2411_v42  ;;  %v2535_v47 = vmax.f32 %v2409_v40, 0.0 }
 0x28b   : > { %v2538_v46 = vmax.f32 %v2420_v21, 0.0 }
 0x28c   : > { %v2536_v48 = vmax.f32 %v2412_v26, 0.0 }
 0x28d   : > { %v2568_v49 = vpack.c.bf16 %v2538_v46, %v2537_v43 }
 0x28e   : > { %v2567_v53 = vpack.c.bf16 %v2536_v48, %v2535_v47  ;;  %v3971_v54 = vpop.f32.mrb[36].mxu0 }
 0x28f   : > { %v2433_v52 = vadd.f32 %v3971_v54, %v5051_v51  ;;  %v2424_v58 = vpop.f32.mrb[37].mxu0 }
 0x290   : > { %v2425_v55 = vadd.f32 %v5051_v51, %v2424_v58  ;;  %v3972_v59 = vpop.f32.mrb[38].mxu0  ;;  %4009 = vmatprep.mubr.msk.bf16.mxu1 %vm2325_vm2, %v2567_v53 }
 0x291   : > { %v2436_v60 = vadd.f32 %v3972_v59, %v5051_v51  ;;  %v2427_v61 = vpop.f32.mrb[39].mxu0  ;;  %4010 = vmatmul.mubr.msk.bf16.vlgmr.msra.gmra.mrb[0].mxu1 %vm2325_vm2, %v2568_v49  ;;  %v2541_v1 = vmax.f32 %v2433_v52, 0.0 }
 0x292   : > { %v2428_v0 = vadd.f32 %v5051_v51, %v2427_v61  ;;  %v2539_v2 = vmax.f32 %v2425_v55, 0.0 }
 0x293   : > { %v2542_v27 = vmax.f32 %v2436_v60, 0.0 }
 0x294   : > { %v2540_v32 = vmax.f32 %v2428_v0, 0.0 }
 0x295   : > { %v2570_v3 = vpack.c.bf16 %v2542_v27, %v2541_v1 }
 0x296   : > { %v2569_v4 = vpack.c.bf16 %v2540_v32, %v2539_v2  ;;  %v3975_v6 = vpop.f32.mrb[40].mxu0 }
 0x297   : > { %v2449_v9 = vadd.f32 %v3975_v6, %v5051_v51  ;;  %v2440_v5 = vpop.f32.mrb[41].mxu0 }
 0x298   : > { %v2441_v57 = vadd.f32 %v5051_v51, %v2440_v5  ;;  %v3976_v11 = vpop.f32.mrb[42].mxu0  ;;  %4013 = vmatprep.mubr.msk.bf16.mxu1 %vm2325_vm2, %v2569_v4 }
 0x299   : > { %v2452_v10 = vadd.f32 %v3976_v11, %v5051_v51  ;;  %v2443_v13 = vpop.f32.mrb[43].mxu0  ;;  %4014 = vmatmul.mubr.msk.bf16.gmra.mrb[4].mxu1 %vm2325_vm2, %v2570_v3  ;;  %v2545_v18 = vmax.f32 %v2449_v9, 0.0 }
 0x29a   : > { %v2444_v14 = vadd.f32 %v5051_v51, %v2443_v13  ;;  %v2543_v19 = vmax.f32 %v2441_v57, 0.0 }
 0x29b   : > { %v2546_v33 = vmax.f32 %v2452_v10, 0.0 }
 0x29c   : > { %v2544_v38 = vmax.f32 %v2444_v14, 0.0 }
 0x29d   : > { %v2572_v22 = vpack.c.bf16 %v2546_v33, %v2545_v18 }
 0x29e   : > { %v2571_v25 = vpack.c.bf16 %v2544_v38, %v2543_v19  ;;  %v3979_v28 = vpop.f32.mrb[44].mxu0 }
 0x29f   : > { %v2465_v29 = vadd.f32 %v3979_v28, %v5051_v51  ;;  %v2456_v30 = vpop.f32.mrb[45].mxu0 }
 0x2a0   : > { %v2457_v12 = vadd.f32 %v5051_v51, %v2456_v30  ;;  %v3980_v35 = vpop.f32.mrb[46].mxu0  ;;  %4017 = vmatprep.mubr.msk.bf16.mxu1 %vm2325_vm2, %v2571_v25 }
 0x2a1   : > { %v2468_v20 = vadd.f32 %v3980_v35, %v5051_v51  ;;  %v2459_v36 = vpop.f32.mrb[47].mxu0  ;;  %4018 = vmatmul.mubr.msk.bf16.gmra.mrb[8].mxu1 %vm2325_vm2, %v2572_v22  ;;  %v2549_v63 = vmax.f32 %v2465_v29, 0.0 }
 0x2a2   : > { %v2460_v37 = vadd.f32 %v5051_v51, %v2459_v36  ;;  %v2547_v7 = vmax.f32 %v2457_v12, 0.0 }
 0x2a3   : > { %v2550_v39 = vmax.f32 %v2468_v20, 0.0 }
 0x2a4   : > { %v2548_v44 = vmax.f32 %v2460_v37, 0.0  ;;  %v5101_v37 = vpop.permute.xlu0 %2846 }
 0x2a5   : > { %v2574_v8 = vpack.c.bf16 %v2550_v39, %v2549_v63 }
 0x2a6   : > { %v2573_v15 = vpack.c.bf16 %v2548_v44, %v2547_v7  ;;  %v3983_v16 = vpop.f32.mrb[48].mxu0 }
 0x2a7   : > { %v2481_v23 = vadd.f32 %v3983_v16, %v5051_v51  ;;  %v2472_v24 = vpop.f32.mrb[49].mxu0 }
 0x2a8   : > { %v2473_v31 = vadd.f32 %v5051_v51, %v2472_v24  ;;  %v3984_v45 = vpop.f32.mrb[50].mxu0  ;;  %4021 = vmatprep.mubr.msk.bf16.mxu1 %vm2325_vm2, %v2573_v15 }
 0x2a9   : > { %v2484_v50 = vadd.f32 %v3984_v45, %v5051_v51  ;;  %v2475_v62 = vpop.f32.mrb[51].mxu0  ;;  %4022 = vmatmul.mubr.msk.bf16.gmra.mrb[12].mxu1 %vm2325_vm2, %v2574_v8  ;;  %v2553_v17 = vmax.f32 %v2481_v23, 0.0 }
 0x2aa   : > { %v2476_v56 = vadd.f32 %v5051_v51, %v2475_v62  ;;  %v2551_v40 = vmax.f32 %v2473_v31, 0.0 }
 0x2ab   : > { %v2554_v34 = vmax.f32 %v2484_v50, 0.0 }
 0x2ac   : > { %v2552_v41 = vmax.f32 %v2476_v56, 0.0 }
 0x2ad   : > { %v2576_v21 = vpack.c.bf16 %v2554_v34, %v2553_v17 }
 0x2ae   : > { %v2575_v42 = vpack.c.bf16 %v2552_v41, %v2551_v40  ;;  %v3987_v26 = vpop.f32.mrb[52].mxu0 }
 0x2af   : > { %v2497_v43 = vadd.f32 %v3987_v26, %v5051_v51  ;;  %v2488_v46 = vpop.f32.mrb[53].mxu0 }
 0x2b0   : > { %v2489_v47 = vadd.f32 %v5051_v51, %v2488_v46  ;;  %v3988_v48 = vpop.f32.mrb[54].mxu0  ;;  %4025 = vmatprep.mubr.msk.bf16.mxu1 %vm2325_vm2, %v2575_v42 }
 0x2b1   : > { %v2500_v49 = vadd.f32 %v3988_v48, %v5051_v51  ;;  %v2491_v53 = vpop.f32.mrb[55].mxu0  ;;  %4026 = vmatmul.mubr.msk.bf16.gmra.mrb[16].mxu1 %vm2325_vm2, %v2576_v21  ;;  %v2557_v52 = vmax.f32 %v2497_v43, 0.0 }
 0x2b2   : > { %v2492_v54 = vadd.f32 %v5051_v51, %v2491_v53  ;;  %v2555_v55 = vmax.f32 %v2489_v47, 0.0 }
 0x2b3   : > { %v2558_v58 = vmax.f32 %v2500_v49, 0.0 }
 0x2b4   : > { %v2556_v59 = vmax.f32 %v2492_v54, 0.0 }
 0x2b5   : > { %v2578_v60 = vpack.c.bf16 %v2558_v58, %v2557_v52 }
 0x2b6   : > { %v2577_v61 = vpack.c.bf16 %v2556_v59, %v2555_v55  ;;  %v3991_v0 = vpop.f32.mrb[56].mxu0 }
 0x2b7   : > { %v2513_v1 = vadd.f32 %v3991_v0, %v5051_v51  ;;  %v2504_v27 = vpop.f32.mrb[57].mxu0 }
 0x2b8   : > { %v2505_v2 = vadd.f32 %v5051_v51, %v2504_v27  ;;  %v3992_v32 = vpop.f32.mrb[58].mxu0  ;;  %4029 = vmatprep.mubr.msk.bf16.mxu1 %vm2325_vm2, %v2577_v61 }
 0x2b9   : > { %v2516_v3 = vadd.f32 %v3992_v32, %v5051_v51  ;;  %v2507_v4 = vpop.f32.mrb[59].mxu0  ;;  %4030 = vmatmul.mubr.msk.bf16.gmra.mrb[20].mxu1 %vm2325_vm2, %v2578_v60  ;;  %v2561_v9 = vmax.f32 %v2513_v1, 0.0 }
 0x2ba   : > { %v2508_v6 = vadd.f32 %v5051_v51, %v2507_v4  ;;  %v2559_v57 = vmax.f32 %v2505_v2, 0.0 }
 0x2bb   : > { %v2562_v5 = vmax.f32 %v2516_v3, 0.0 }
 0x2bc   : > { %v2560_v11 = vmax.f32 %v2508_v6, 0.0 }
 0x2bd   : > { %v2580_v10 = vpack.c.bf16 %v2562_v5, %v2561_v9 }
 0x2be   : > { %v2579_v13 = vpack.c.bf16 %v2560_v11, %v2559_v57  ;;  %v3995_v14 = vpop.f32.mrb[60].mxu0 }
 0x2bf   : > { %v2529_v18 = vadd.f32 %v3995_v14, %v5051_v51  ;;  %v2520_v33 = vpop.f32.mrb[61].mxu0 }
 0x2c0   : > { %v2521_v19 = vadd.f32 %v5051_v51, %v2520_v33  ;;  %v3996_v38 = vpop.f32.mrb[62].mxu0  ;;  %4033 = vmatprep.mubr.msk.bf16.mxu1 %vm2325_vm2, %v2579_v13 }
 0x2c1   : > { %v2532_v22 = vadd.f32 %v3996_v38, %v5051_v51  ;;  %v2523_v25 = vpop.f32.mrb[63].mxu0  ;;  %4034 = vmatmul.mubr.msk.bf16.gmra.mrb[24].mxu1 %vm2325_vm2, %v2580_v10  ;;  %v2565_v29 = vmax.f32 %v2529_v18, 0.0 }
 0x2c2   : > { %v2524_v28 = vadd.f32 %v5051_v51, %v2523_v25  ;;  %v2563_v12 = vmax.f32 %v2521_v19, 0.0 }
 0x2c3   : > { %v2566_v30 = vmax.f32 %v2532_v22, 0.0 }
 0x2c4   : > { %v2564_v35 = vmax.f32 %v2524_v28, 0.0 }
 0x2c5   : > { %v2582_v20 = vpack.c.bf16 %v2566_v30, %v2565_v29 }
 0x2c6   : > { %v2581_v36 = vpack.c.bf16 %v2564_v35, %v2563_v12 }
 0x2c8   : > { %4037 = vmatprep.mubr.msk.bf16.mxu1 %vm2325_vm2, %v2581_v36 }
 0x2c9   : > { %4038 = vmatmul.mubr.msk.bf16.gmra.mrb[28].mxu1 %vm2325_vm2, %v2582_v20 }
 0x364   : > { %v4011_v63 = vpop.f32.mrb[0].mxu1 }
 0x365   : > { %v2851_v39 = vadd.f32 %v4011_v63, %v5101_v37  ;;  %v2713_v7 = vpop.f32.mrb[1].mxu1 }
 0x366   : > { %v2849_v44 = vadd.f32 %v5101_v37, %v2713_v7  ;;  %v4012_v8 = vpop.f32.mrb[2].mxu1 }
 0x367   : > { %v3444_v51 = vmul.f32 -1.442695, %v2851_v39  ;;  %v2852_v15 = vadd.f32 %v4012_v8, %v5101_v37  ;;  %v2716_v16 = vpop.f32.mrb[3].mxu1 }
 0x368   : > { %v3442_v23 = vmul.f32 -1.442695, %v2849_v44  ;;  %v2850_v24 = vadd.f32 %v5101_v37, %v2716_v16 }
 0x369   : > { %4312 = vpow2.f32 %v3444_v51  ;;  %v3445_v31 = vmul.f32 -1.442695, %v2852_v15 }
 0x36a   : > { %4314 = vpow2.f32 %v3442_v23  ;;  %v3443_v45 = vmul.f32 -1.442695, %v2850_v24 }
 0x36b   : > { %4316 = vpow2.f32 %v3445_v31 }
 0x36c   : > { %4318 = vpow2.f32 %v3443_v45  ;;  %v4015_v50 = vpop.f32.mrb[4].mxu1 }
 0x36d   : > { %v2855_v62 = vadd.f32 %v4015_v50, %v5101_v37  ;;  %v2729_v56 = vpop.f32.mrb[5].mxu1 }
 0x36e   : > { %v2853_v17 = vadd.f32 %v5101_v37, %v2729_v56  ;;  %v4016_v34 = vpop.f32.mrb[6].mxu1 }
 0x36f   : > { %v3448_v40 = vmul.f32 -1.442695, %v2855_v62  ;;  %v2856_v41 = vadd.f32 %v4016_v34, %v5101_v37  ;;  %v2732_v21 = vpop.f32.mrb[7].mxu1 }
 0x370   : > { %v3446_v42 = vmul.f32 -1.442695, %v2853_v17  ;;  %v2854_v26 = vadd.f32 %v5101_v37, %v2732_v21 }
 0x371   : > { %4320 = vpow2.f32 %v3448_v40  ;;  %v3449_v43 = vmul.f32 -1.442695, %v2856_v41 }
 0x372   : > { %4322 = vpow2.f32 %v3446_v42  ;;  %v3447_v46 = vmul.f32 -1.442695, %v2854_v26 }
 0x373   : > { %v4313_v47 = vpop.eup %4312  ;;  %4324 = vpow2.f32 %v3449_v43 }
 0x374   : > { %v4315_v48 = vpop.eup %4314  ;;  %v2979_v49 = vadd.f32 1.0, %v4313_v47  ;;  %4326 = vpow2.f32 %v3447_v46  ;;  %v4019_v53 = vpop.f32.mrb[8].mxu1 }
 0x375   : > { %v4317_v54 = vpop.eup %4316  ;;  %v2977_v52 = vadd.f32 1.0, %v4315_v48  ;;  %v2859_v58 = vadd.f32 %v4019_v53, %v5101_v37  ;;  %v2745_v55 = vpop.f32.mrb[9].mxu1 }
 0x376   : > { %v4319_v59 = vpop.eup %4318  ;;  %4328 = vrcp.f32 %v2979_v49  ;;  %v2980_v60 = vadd.f32 1.0, %v4317_v54  ;;  %v2857_v61 = vadd.f32 %v5101_v37, %v2745_v55  ;;  %v4020_v0 = vpop.f32.mrb[10].mxu1 }
 0x377   : > { %4330 = vrcp.f32 %v2977_v52  ;;  %v2978_v1 = vadd.f32 1.0, %v4319_v59  ;;  %v3452_v27 = vmul.f32 -1.442695, %v2859_v58  ;;  %v2860_v2 = vadd.f32 %v4020_v0, %v5101_v37  ;;  %v2748_v32 = vpop.f32.mrb[11].mxu1 }
 0x378   : > { %4332 = vrcp.f32 %v2980_v60  ;;  %v3450_v3 = vmul.f32 -1.442695, %v2857_v61  ;;  %v2858_v4 = vadd.f32 %v5101_v37, %v2748_v32 }
 0x379   : > { %4334 = vrcp.f32 %v2978_v1  ;;  %v3453_v6 = vmul.f32 -1.442695, %v2860_v2 }
 0x37a   : > { %4336 = vpow2.f32 %v3452_v27  ;;  %v3451_v9 = vmul.f32 -1.442695, %v2858_v4 }
 0x37b   : > { %v4321_v5 = vpop.eup %4320  ;;  %4338 = vpow2.f32 %v3450_v3 }
 0x37c   : > { %v4323_v57 = vpop.eup %4322  ;;  %v2983_v11 = vadd.f32 1.0, %v4321_v5  ;;  %4340 = vpow2.f32 %v3453_v6  ;;  %v4023_v10 = vpop.f32.mrb[12].mxu1 }
 0x37d   : > { %v4325_v13 = vpop.eup %4324  ;;  %v2981_v14 = vadd.f32 1.0, %v4323_v57  ;;  %4342 = vpow2.f32 %v3451_v9  ;;  %v2863_v18 = vadd.f32 %v4023_v10, %v5101_v37  ;;  %v2761_v33 = vpop.f32.mrb[13].mxu1 }
 0x37e   : > { %v4327_v19 = vpop.eup %4326  ;;  %4344 = vrcp.f32 %v2983_v11  ;;  %v2984_v38 = vadd.f32 1.0, %v4325_v13  ;;  %v2861_v22 = vadd.f32 %v5101_v37, %v2761_v33  ;;  %v4024_v25 = vpop.f32.mrb[14].mxu1 }
 0x37f   : > { %4346 = vrcp.f32 %v2981_v14  ;;  %v2982_v28 = vadd.f32 1.0, %v4327_v19  ;;  %v3456_v29 = vmul.f32 -1.442695, %v2863_v18  ;;  %v2864_v30 = vadd.f32 %v4024_v25, %v5101_v37  ;;  %v2764_v12 = vpop.f32.mrb[15].mxu1 }
 0x380   : > { %v4329_v35 = vpop.eup %4328  ;;  %4348 = vrcp.f32 %v2984_v38  ;;  %v3454_v20 = vmul.f32 -1.442695, %v2861_v22  ;;  %v2862_v36 = vadd.f32 %v5101_v37, %v2764_v12 }
 0x381   : > { %v4331_v63 = vpop.eup %4330  ;;  %3076 = vst.msk [vmem:[%s5120_s26 + $0x10] sm:$0xff] %vm3073_vm3, %v4329_v35  ;;  %4350 = vrcp.f32 %v2982_v28  ;;  %v3457_v39 = vmul.f32 -1.442695, %v2864_v30 }
 0x382   : > { %v4333_v7 = vpop.eup %4332  ;;  %3074 = vst.msk [vmem:[%s5120_s26] sm:$0xff] %vm3073_vm3, %v4331_v63  ;;  %4352 = vpow2.f32 %v3456_v29  ;;  %v3455_v44 = vmul.f32 -1.442695, %v2862_v36 }
 0x383   : > { %v4335_v8 = vpop.eup %4334  ;;  %3077 = vst.msk [vmem:[%s5120_s26 + $0x18] sm:$0xff] %vm3073_vm3, %v4333_v7  ;;  %4354 = vpow2.f32 %v3454_v20 }
 0x384   : > { %v4337_v51 = vpop.eup %4336  ;;  %3075 = vst.msk [vmem:[%s5120_s26 + $0x8] sm:$0xff] %vm3073_vm3, %v4335_v8  ;;  %4356 = vpow2.f32 %v3457_v39  ;;  %v4027_v15 = vpop.f32.mrb[16].mxu1 }
 0x385   : > { %v4339_v16 = vpop.eup %4338  ;;  %v2987_v23 = vadd.f32 1.0, %v4337_v51  ;;  %4358 = vpow2.f32 %v3455_v44  ;;  %v2867_v24 = vadd.f32 %v4027_v15, %v5101_v37  ;;  %v2777_v31 = vpop.f32.mrb[17].mxu1 }
 0x386   : > { %v4341_v45 = vpop.eup %4340  ;;  %v2985_v50 = vadd.f32 1.0, %v4339_v16  ;;  %v2865_v62 = vadd.f32 %v5101_v37, %v2777_v31  ;;  %v4028_v56 = vpop.f32.mrb[18].mxu1 }
 0x387   : > { %v4343_v17 = vpop.eup %4342  ;;  %4360 = vrcp.f32 %v2987_v23  ;;  %v2988_v34 = vadd.f32 1.0, %v4341_v45  ;;  %v3460_v40 = vmul.f32 -1.442695, %v2867_v24  ;;  %v2868_v41 = vadd.f32 %v4028_v56, %v5101_v37  ;;  %v2780_v21 = vpop.f32.mrb[19].mxu1 }
 0x388   : > { %v4345_v42 = vpop.eup %4344  ;;  %4362 = vrcp.f32 %v2985_v50  ;;  %v2986_v26 = vadd.f32 1.0, %v4343_v17  ;;  %v3458_v43 = vmul.f32 -1.442695, %v2865_v62  ;;  %v2866_v46 = vadd.f32 %v5101_v37, %v2780_v21 }
 0x389   : > { %v4347_v47 = vpop.eup %4346  ;;  %3080 = vst.msk [vmem:[%s5120_s26 + $0x30] sm:$0xff] %vm3073_vm3, %v4345_v42  ;;  %4364 = vrcp.f32 %v2988_v34  ;;  %v3461_v48 = vmul.f32 -1.442695, %v2868_v41 }
 0x38a   : > { %v4349_v49 = vpop.eup %4348  ;;  %3078 = vst.msk [vmem:[%s5120_s26 + $0x20] sm:$0xff] %vm3073_vm3, %v4347_v47  ;;  %4366 = vrcp.f32 %v2986_v26  ;;  %v3459_v53 = vmul.f32 -1.442695, %v2866_v46 }
 0x38b   : > { %v4351_v54 = vpop.eup %4350  ;;  %3081 = vst.msk [vmem:[%s5120_s26 + $0x38] sm:$0xff] %vm3073_vm3, %v4349_v49  ;;  %4368 = vpow2.f32 %v3460_v40 }
 0x38c   : > { %v4353_v52 = vpop.eup %4352  ;;  %3079 = vst.msk [vmem:[%s5120_s26 + $0x28] sm:$0xff] %vm3073_vm3, %v4351_v54  ;;  %4370 = vpow2.f32 %v3458_v43  ;;  %v4031_v58 = vpop.f32.mrb[20].mxu1 }
 0x38d   : > { %v4355_v55 = vpop.eup %4354  ;;  %v2991_v59 = vadd.f32 1.0, %v4353_v52  ;;  %4372 = vpow2.f32 %v3461_v48  ;;  %v2871_v60 = vadd.f32 %v4031_v58, %v5101_v37  ;;  %v2793_v61 = vpop.f32.mrb[21].mxu1 }
 0x38e   : > { %v4357_v0 = vpop.eup %4356  ;;  %v2989_v1 = vadd.f32 1.0, %v4355_v55  ;;  %4374 = vpow2.f32 %v3459_v53  ;;  %v2869_v27 = vadd.f32 %v5101_v37, %v2793_v61  ;;  %v4032_v2 = vpop.f32.mrb[22].mxu1 }
 0x38f   : > { %v4359_v32 = vpop.eup %4358  ;;  %4376 = vrcp.f32 %v2991_v59  ;;  %v2992_v3 = vadd.f32 1.0, %v4357_v0  ;;  %v3464_v4 = vmul.f32 -1.442695, %v2871_v60  ;;  %v2872_v6 = vadd.f32 %v4032_v2, %v5101_v37  ;;  %v2796_v9 = vpop.f32.mrb[23].mxu1 }
 0x390   : > { %4378 = vrcp.f32 %v2989_v1  ;;  %v2990_v5 = vadd.f32 1.0, %v4359_v32  ;;  %v3462_v57 = vmul.f32 -1.442695, %v2869_v27  ;;  %v2870_v11 = vadd.f32 %v5101_v37, %v2796_v9 }
 0x391   : > { %v4361_v10 = vpop.eup %4360  ;;  %4380 = vrcp.f32 %v2992_v3  ;;  %v3465_v13 = vmul.f32 -1.442695, %v2872_v6 }
 0x392   : > { %v4363_v14 = vpop.eup %4362  ;;  %3084 = vst.msk [vmem:[%s5120_s26 + $0x50] sm:$0xff] %vm3073_vm3, %v4361_v10  ;;  %4382 = vrcp.f32 %v2990_v5  ;;  %v3463_v18 = vmul.f32 -1.442695, %v2870_v11 }
 0x393   : > { %v4365_v33 = vpop.eup %4364  ;;  %3082 = vst.msk [vmem:[%s5120_s26 + $0x40] sm:$0xff] %vm3073_vm3, %v4363_v14  ;;  %4384 = vpow2.f32 %v3464_v4 }
 0x394   : > { %v4367_v19 = vpop.eup %4366  ;;  %3085 = vst.msk [vmem:[%s5120_s26 + $0x58] sm:$0xff] %vm3073_vm3, %v4365_v33  ;;  %4386 = vpow2.f32 %v3462_v57  ;;  %v4035_v38 = vpop.f32.mrb[24].mxu1 }
 0x395   : > { %v4369_v22 = vpop.eup %4368  ;;  %3083 = vst.msk [vmem:[%s5120_s26 + $0x48] sm:$0xff] %vm3073_vm3, %v4367_v19  ;;  %4388 = vpow2.f32 %v3465_v13  ;;  %v2875_v25 = vadd.f32 %v4035_v38, %v5101_v37  ;;  %v2809_v28 = vpop.f32.mrb[25].mxu1 }
 0x396   : > { %v4371_v29 = vpop.eup %4370  ;;  %v2995_v30 = vadd.f32 1.0, %v4369_v22  ;;  %4390 = vpow2.f32 %v3463_v18  ;;  %v2873_v12 = vadd.f32 %v5101_v37, %v2809_v28  ;;  %v4036_v35 = vpop.f32.mrb[26].mxu1 }
 0x397   : > { %v4373_v20 = vpop.eup %4372  ;;  %v2993_v36 = vadd.f32 1.0, %v4371_v29  ;;  %v2876_v63 = vadd.f32 %v4036_v35, %v5101_v37  ;;  %v2812_v39 = vpop.f32.mrb[27].mxu1  ;;  %v3468_v8 = vmul.f32 -1.442695, %v2875_v25 }
 0x398   : > { %v4375_v7 = vpop.eup %4374  ;;  %4392 = vrcp.f32 %v2995_v30  ;;  %v2996_v44 = vadd.f32 1.0, %v4373_v20  ;;  %v2874_v51 = vadd.f32 %v5101_v37, %v2812_v39  ;;  %v3466_v23 = vmul.f32 -1.442695, %v2873_v12 }
 0x399   : > { %v4377_v15 = vpop.eup %4376  ;;  %4394 = vrcp.f32 %v2993_v36  ;;  %v2994_v16 = vadd.f32 1.0, %v4375_v7  ;;  %v3469_v31 = vmul.f32 -1.442695, %v2876_v63 }
 0x39a   : > { %v4379_v24 = vpop.eup %4378  ;;  %3088 = vst.msk [vmem:[%s5120_s26 + $0x70] sm:$0xff] %vm3073_vm3, %v4377_v15  ;;  %4396 = vrcp.f32 %v2996_v44  ;;  %v3467_v50 = vmul.f32 -1.442695, %v2874_v51 }
 0x39b   : > { %v4381_v45 = vpop.eup %4380  ;;  %3086 = vst.msk [vmem:[%s5120_s26 + $0x60] sm:$0xff] %vm3073_vm3, %v4379_v24  ;;  %4398 = vrcp.f32 %v2994_v16 }
 0x39c   : > { %v4383_v62 = vpop.eup %4382  ;;  %3089 = vst.msk [vmem:[%s5120_s26 + $0x78] sm:$0xff] %vm3073_vm3, %v4381_v45  ;;  %4400 = vpow2.f32 %v3468_v8  ;;  %v4039_v56 = vpop.f32.mrb[28].mxu1 }
 0x39d   : > { %v4385_v17 = vpop.eup %4384  ;;  %3087 = vst.msk [vmem:[%s5120_s26 + $0x68] sm:$0xff] %vm3073_vm3, %v4383_v62  ;;  %4402 = vpow2.f32 %v3466_v23  ;;  %v2879_v34 = vadd.f32 %v4039_v56, %v5101_v37  ;;  %v2825_v40 = vpop.f32.mrb[29].mxu1 }
 0x39e   : > { %v4387_v41 = vpop.eup %4386  ;;  %v2999_v21 = vadd.f32 1.0, %v4385_v17  ;;  %4404 = vpow2.f32 %v3469_v31  ;;  %v2877_v42 = vadd.f32 %v5101_v37, %v2825_v40  ;;  %v4040_v26 = vpop.f32.mrb[30].mxu1 }
 0x39f   : > { %v4389_v43 = vpop.eup %4388  ;;  %v2997_v46 = vadd.f32 1.0, %v4387_v41  ;;  %4406 = vpow2.f32 %v3467_v50  ;;  %v2880_v47 = vadd.f32 %v4040_v26, %v5101_v37  ;;  %v2828_v48 = vpop.f32.mrb[31].mxu1  ;;  %v3472_v54 = vmul.f32 -1.442695, %v2879_v34 }
 0x3a0   : > { %v4391_v49 = vpop.eup %4390  ;;  %4408 = vrcp.f32 %v2999_v21  ;;  %v3000_v53 = vadd.f32 1.0, %v4389_v43  ;;  %v2878_v52 = vadd.f32 %v5101_v37, %v2828_v48  ;;  %v3470_v55 = vmul.f32 -1.442695, %v2877_v42 }
 0x3a1   : > { %4410 = vrcp.f32 %v2997_v46  ;;  %v2998_v58 = vadd.f32 1.0, %v4391_v49  ;;  %v3473_v60 = vmul.f32 -1.442695, %v2880_v47 }
 0x3a2   : > { %v4393_v59 = vpop.eup %4392  ;;  %4412 = vrcp.f32 %v3000_v53  ;;  %v3471_v0 = vmul.f32 -1.442695, %v2878_v52 }
 0x3a3   : > { %v4395_v61 = vpop.eup %4394  ;;  %3092 = vst.msk [vmem:[%s5120_s26 + $0x90] sm:$0xff] %vm3073_vm3, %v4393_v59  ;;  %4414 = vrcp.f32 %v2998_v58 }
 0x3a4   : > { %v4397_v1 = vpop.eup %4396  ;;  %3090 = vst.msk [vmem:[%s5120_s26 + $0x80] sm:$0xff] %vm3073_vm3, %v4395_v61  ;;  %4416 = vpow2.f32 %v3472_v54 }
 0x3a5   : > { %v4399_v27 = vpop.eup %4398  ;;  %3093 = vst.msk [vmem:[%s5120_s26 + $0x98] sm:$0xff] %vm3073_vm3, %v4397_v1  ;;  %4418 = vpow2.f32 %v3470_v55 }
 0x3a6   : > { %v4401_v37 = vpop.eup %4400  ;;  %3091 = vst.msk [vmem:[%s5120_s26 + $0x88] sm:$0xff] %vm3073_vm3, %v4399_v27  ;;  %4420 = vpow2.f32 %v3473_v60 }
 0x3a7   : > { %v4403_v2 = vpop.eup %4402  ;;  %v3003_v32 = vadd.f32 1.0, %v4401_v37  ;;  %4422 = vpow2.f32 %v3471_v0 }
 0x3a8   : > { %v4405_v3 = vpop.eup %4404  ;;  %v3001_v4 = vadd.f32 1.0, %v4403_v2 }
 0x3a9   : > { %v4407_v6 = vpop.eup %4406  ;;  %4424 = vrcp.f32 %v3003_v32  ;;  %v3004_v9 = vadd.f32 1.0, %v4405_v3 }
 0x3aa   : > { %v4409_v5 = vpop.eup %4408  ;;  %4426 = vrcp.f32 %v3001_v4  ;;  %v3002_v57 = vadd.f32 1.0, %v4407_v6 }
 0x3ab   : > { %v4411_v11 = vpop.eup %4410  ;;  %3096 = vst.msk [vmem:[%s5120_s26 + $0xb0] sm:$0xff] %vm3073_vm3, %v4409_v5  ;;  %4428 = vrcp.f32 %v3004_v9 }
 0x3ac   : > { %v4413_v10 = vpop.eup %4412  ;;  %3094 = vst.msk [vmem:[%s5120_s26 + $0xa0] sm:$0xff] %vm3073_vm3, %v4411_v11  ;;  %4430 = vrcp.f32 %v3002_v57 }
 0x3ad   : > { %v4415_v13 = vpop.eup %4414  ;;  %3097 = vst.msk [vmem:[%s5120_s26 + $0xb8] sm:$0xff] %vm3073_vm3, %v4413_v10 }
 0x3ae   : > { %v4417_v14 = vpop.eup %4416  ;;  %3095 = vst.msk [vmem:[%s5120_s26 + $0xa8] sm:$0xff] %vm3073_vm3, %v4415_v13 }
 0x3af   : > { %v4419_v18 = vpop.eup %4418  ;;  %v3007_v33 = vadd.f32 1.0, %v4417_v14 }
 0x3b0   : > { %v4421_v19 = vpop.eup %4420  ;;  %v3005_v38 = vadd.f32 1.0, %v4419_v18 }
 0x3b1   : > { %v4423_v22 = vpop.eup %4422  ;;  %4432 = vrcp.f32 %v3007_v33  ;;  %v3008_v25 = vadd.f32 1.0, %v4421_v19 }
 0x3b2   : > { %4434 = vrcp.f32 %v3005_v38  ;;  %v3006_v28 = vadd.f32 1.0, %v4423_v22 }
 0x3b3   : > { %v4425_v29 = vpop.eup %4424  ;;  %4436 = vrcp.f32 %v3008_v25 }
 0x3b4   : > { %v4427_v30 = vpop.eup %4426  ;;  %3100 = vst.msk [vmem:[%s5120_s26 + $0xd0] sm:$0xff] %vm3073_vm3, %v4425_v29  ;;  %4438 = vrcp.f32 %v3006_v28 }
 0x3b5   : > { %v4429_v12 = vpop.eup %4428  ;;  %3098 = vst.msk [vmem:[%s5120_s26 + $0xc0] sm:$0xff] %vm3073_vm3, %v4427_v30 }
 0x3b6   : > { %v4431_v35 = vpop.eup %4430  ;;  %3101 = vst.msk [vmem:[%s5120_s26 + $0xd8] sm:$0xff] %vm3073_vm3, %v4429_v12 }
 0x3b7   : > { %3099 = vst.msk [vmem:[%s5120_s26 + $0xc8] sm:$0xff] %vm3073_vm3, %v4431_v35 }
 0x3bb   : > { %v4433_v20 = vpop.eup %4432 }
 0x3bc   : > { %v4435_v36 = vpop.eup %4434  ;;  %3104 = vst.msk [vmem:[%s5120_s26 + $0xf0] sm:$0xff] %vm3073_vm3, %v4433_v20 }
 0x3bd   : > { %v4437_v63 = vpop.eup %4436  ;;  %3102 = vst.msk [vmem:[%s5120_s26 + $0xe0] sm:$0xff] %vm3073_vm3, %v4435_v36 }
 0x3be   : > { %v4439_v39 = vpop.eup %4438  ;;  %3105 = vst.msk [vmem:[%s5120_s26 + $0xf8] sm:$0xff] %vm3073_vm3, %v4437_v63 }
 0x3bf   : > { %3103 = vst.msk [vmem:[%s5120_s26 + $0xe8] sm:$0xff] %vm3073_vm3, %v4439_v39 }
 0x3c0 PF: > { %s16_s21 = sadd.s32 1, %s4446_s21  }
 0x3c1   : > { %p13_p4 = scmp.ge.s32.totalorder %s16_s21, 4  }
 0x3c3   :  { %15 = sbr.rel (!%p13_p4) target bundleno = 1 (0x1), region = 81 }

</bundles_post_ra>
